<compile_context>
chip_gen: v7x
topology: tpu7x:2x2x1
jax: 0.10.0
libtpu: 0.0.40
codegen_flags: <defaults>
</compile_context>

<pallas_src>
import numpy as np

import jax
import jax.numpy as jnp
from jax.experimental import pallas as pl
from jax.experimental.pallas import tpu as pltpu


# ----------------------------------------------------------------------------
# Constants (NIQE-style 7x7 Gaussian window, separable 1-D taps)
# ----------------------------------------------------------------------------
_KSIZE = 7
_PAD = (_KSIZE - 1) // 2
_NFEAT = 6
_EPS = 1e-6
_C = 1.0 / 255.0  # MSCN stabilizer for [0,1] luminance ( == C=1 on [0,255] data)


def _gauss_taps(k=_KSIZE, sigma=7.0 / 6.0):
    half = (k - 1) / 2.0
    ys = np.arange(k, dtype=np.float64) - half
    g = np.exp(-(ys ** 2) / (2.0 * sigma * sigma))
    g = g / g.sum()  # outer(g, g) reproduces the normalized 2-D window
    return [float(v) for v in g]


_TAPS = _gauss_taps()


def _recip(x):
    # EUP approx reciprocal + one Newton-Raphson step -> ~full f32 accuracy
    # while keeping the expensive full-plane divide off the VALU critical path.
    r = pl.reciprocal(x, approx=True)
    return r * (2.0 - x * r)


# ----------------------------------------------------------------------------
# Synthetic MVG template (stand-in for ILNIQE_templateModel.mat)
# ----------------------------------------------------------------------------
def make_template_params(n_feat=_NFEAT, seed=0):
    # Deterministic synthetic template (mu, Sigma^-1), baked into the kernel as
    # compile-time constants (the real module loads a fixed pretrained .mat).
    rng = np.random.RandomState(seed)
    mu = (rng.randn(n_feat) * 0.1).astype(np.float64)
    a = rng.randn(n_feat, n_feat)
    sigma = a @ a.T / n_feat + np.eye(n_feat)
    sinv = np.linalg.inv(sigma)          # well-conditioned by construction
    sinv = 0.5 * (sinv + sinv.T)         # symmetric 21-term quadratic form
    # TODO(synk): torch._C._LinAlgError fallback (return None) has no JAX
    # equivalent here; Sigma is constructed to always be invertible.
    return mu, sinv


# ----------------------------------------------------------------------------
# Hoisted numpy constants: banded horizontal conv + seam-aware pooling matrices
# ----------------------------------------------------------------------------
def _build_constants(H, W, G, patch):
    Wp = W + 2 * _PAD
    Wtot = G * Wp
    Wfull = Wtot - 2 * _PAD
    npy, npx = H // patch, W // patch
    taps = np.asarray(_TAPS, np.float64)

    # Banded horizontal 7-tap operator: out[:, xo] = sum_t taps[t] * in[:, xo+t]
    hband = np.zeros((Wtot, Wfull), np.float32)
    for xo in range(Wfull):
        for t in range(_KSIZE):
            hband[xo + t, xo] = taps[t]

    inv_pp = 1.0 / float(patch * patch)

    # Row pooling / upsampling (shared by all packed images).
    pool_r = np.zeros((npy, H), np.float32)
    for y in range(H):
        pool_r[y // patch, y] = 1.0
    up_r = pool_r.T.copy()

    # Column pooling / upsampling: block-diagonal over packed strips; seam and
    # halo columns get zero weight so packing never mixes images.  inv_pp is
    # folded into pool_c so pooled outputs are per-patch means directly.
    pool_c = np.zeros((Wfull, G * npx), np.float32)
    up_c = np.zeros((G * npx, Wfull), np.float32)
    for g in range(G):
        for w in range(W):
            x = g * Wp + w                 # valid MSCN column of image g
            col = g * npx + (w // patch)
            pool_c[x, col] = inv_pp
            up_c[col, x] = 1.0

    # Block-diagonal row pooling for the 4 sublane-stacked moment planes.
    pool_r4 = np.kron(np.eye(4, dtype=np.float32), pool_r).astype(np.float32)

    return hband, pool_r, pool_c, up_r, up_c, pool_r4


def _pick_vmem_limit_bytes():
    # v7x: 64 MiB physical VMEM per core -> leave headroom; v5e/v6e: 128 MiB.
    try:
        kind = jax.devices()[0].device_kind.lower()
    except Exception:
        kind = ""
    if "v5" in kind or "v6" in kind:
        return 96 * 1024 * 1024
    return 48 * 1024 * 1024


# ----------------------------------------------------------------------------
# Fused kernel: gray+pad -> MSCN -> patch features -> score (G images / step)
# ----------------------------------------------------------------------------
def _make_fused_kernel(H, W, G, patch, mu_np, sinv_np):
    Hp, Wp = H + 2 * _PAD, W + 2 * _PAD
    Wtot = G * Wp
    Wfull = Wtot - 2 * _PAD
    npy, npx = H // patch, W // patch
    inv_npatch = 1.0 / float(npy * npx)
    mu_c = [float(v) for v in mu_np]
    sinv_c = [[float(sinv_np[f, g]) for g in range(_NFEAT)] for f in range(_NFEAT)]

    def kernel(rgb_ref, hband_ref, pr_ref, pc_ref, ur_ref, uc_ref, pr4_ref,
               out_ref, pad_ref):
        # rgb_ref : (G, 3, H, W)  raw RGB block (G images packed per grid step)
        # pad_ref : (Hp, Wtot)    VMEM scratch, edge-padded gray strips, packed
        # out_ref : (G, 1, 1)     per-image scores

        # ---- Stage 0: fused luminance + in-kernel edge replication ----------
        x = rgb_ref[...]
        gray = 0.299 * x[:, 0] + 0.587 * x[:, 1] + 0.114 * x[:, 2]   # (G, H, W)
        for g in range(G):
            off = g * Wp
            gg = gray[g]                                             # (H, W)
            pad_ref[_PAD:_PAD + H, off + _PAD:off + _PAD + W] = gg
            pad_ref[_PAD:_PAD + H, off:off + _PAD] = (
                jnp.broadcast_to(gg[:, 0:1], (H, _PAD)))
            pad_ref[_PAD:_PAD + H, off + _PAD + W:off + Wp] = (
                jnp.broadcast_to(gg[:, W - 1:W], (H, _PAD)))
        # Top / bottom halo: replicate first/last column-padded interior rows.
        pad_ref[0:_PAD, :] = jnp.broadcast_to(pad_ref[_PAD:_PAD + 1, :],
                                              (_PAD, Wtot))
        pad_ref[_PAD + H:Hp, :] = jnp.broadcast_to(
            pad_ref[_PAD + H - 1:_PAD + H, :], (_PAD, Wtot))

        img = pad_ref[...]                  # (Hp, Wtot)
        img2 = img * img

        # ---- Stage 1: MSCN ---------------------------------------------------
        # Vertical 7-tap pass on the VPU (sublane slices).
        gv = _TAPS[0] * img[0:H, :]
        g2v = _TAPS[0] * img2[0:H, :]
        for dy in range(1, _KSIZE):
            w = _TAPS[dy]
            gv = gv + w * img[dy:dy + H, :]
            g2v = g2v + w * img2[dy:dy + H, :]
        # Horizontal 7-tap pass as a banded constant matmul on the idle MXU
        # (also avoids misaligned lane slices on the VPU/XLU path).
        hband = hband_ref[...]
        mu_loc = jnp.dot(gv, hband, preferred_element_type=jnp.float32)
        mu2_loc = jnp.dot(g2v, hband, preferred_element_type=jnp.float32)

        center = img[_PAD:_PAD + H, _PAD:_PAD + Wfull]
        # NIQE/ILNIQE use sqrt(|filter(x^2) - filter(x)^2|); kept faithful.
        # TODO(synk): a second filtered pass over (x - mu)^2 would be the
        # cancellation-robust form if bitwise parity with a f64 reference matters.
        var = jnp.maximum(mu2_loc - mu_loc * mu_loc, 0.0)
        sigma = jnp.sqrt(var)
        mscn = (center - mu_loc) * _recip(sigma + _C)     # (H, Wfull)

        # ---- Stage 2: per-patch moments via hoisted pooling matmuls ----------
        pool_r = pr_ref[...]        # (npy, H)
        pool_c = pc_ref[...]        # (Wfull, G*npx), inv_pp folded, seams zeroed
        up_r = ur_ref[...]          # (H, npy)
        up_c = uc_ref[...]          # (G*npx, Wfull)
        pool_r4 = pr4_ref[...]      # (4*npy, 4*H) block-diagonal

        mean = jnp.dot(jnp.dot(pool_r, mscn, preferred_element_type=jnp.float32),
                       pool_c, preferred_element_type=jnp.float32)   # (npy, G*npx)
        mean_full = jnp.dot(jnp.dot(up_r, mean, preferred_element_type=jnp.float32),
                            up_c, preferred_element_type=jnp.float32)  # (H, Wfull)

        c = mscn - mean_full
        c2 = c * c
        ca = jnp.abs(c)
        # Batched pooling of the 4 moment planes in one matmul pair.
        stack = jnp.concatenate([c2, c2 * c, c2 * c2, ca], axis=0)   # (4H, Wfull)
        mom = jnp.dot(jnp.dot(pool_r4, stack, preferred_element_type=jnp.float32),
                      pool_c, preferred_element_type=jnp.float32)    # (4npy, G*npx)
        m2 = mom[0 * npy:1 * npy]
        m3 = mom[1 * npy:2 * npy]
        m4 = mom[2 * npy:3 * npy]
        ma = mom[3 * npy:4 * npy]

        # Exact division for the tiny moment ratios (essentially free here).
        std = jnp.sqrt(m2)
        v2 = m2 + _EPS
        skew = m3 / (v2 * jnp.sqrt(v2))
        kurt = m4 / (v2 * v2)
        ggd = (ma * ma) / v2
        feats = (mean, std, ma, skew, kurt, ggd)          # 6x (npy, G*npx)
        # TODO(synk): real ILNIQE additionally uses paired-product AGGD,
        # log-Gabor and color statistics over two scales; only the GGD-style
        # moments are kept (synthetic feature set).

        # ---- Stage 3: Mahalanobis distance (constants baked in, VPU only) ----
        diffs = [feats[f] - mu_c[f] for f in range(_NFEAT)]
        d = jnp.zeros((npy, G * npx), jnp.float32)
        for f in range(_NFEAT):
            d = d + sinv_c[f][f] * (diffs[f] * diffs[f])
            for h in range(f + 1, _NFEAT):
                d = d + (2.0 * sinv_c[f][h]) * (diffs[f] * diffs[h])
        sqrt_d = jnp.sqrt(jnp.maximum(d, 0.0))            # (npy, G*npx)

        for g in range(G):
            s = jnp.sum(sqrt_d[:, g * npx:(g + 1) * npx], keepdims=True)  # (1,1)
            out_ref[g] = s * inv_npatch

    return kernel


# ----------------------------------------------------------------------------
# MetricModel forward (glue)
# ----------------------------------------------------------------------------
def make_metric_forward(H, W, mu_np, sinv_np, patch=8):
    assert H % patch == 0 and W % patch == 0
    Hp, Wp = H + 2 * _PAD, W + 2 * _PAD
    vmem_limit = _pick_vmem_limit_bytes()

    def forward(image):
        """image: NCHW float32 RGB in [0, 1]. Returns (scalar loss, per-image scores)."""
        image = image.astype(jnp.float32)
        B = image.shape[0]

        # Lane-packing factor: pack G padded strips (width Wp) along the lane
        # axis, preferring a G that divides B (no wasted zero-padded slots).
        # NOTE(v7x): capping G at cdiv(B, 2) would keep >=2 grid steps so both
        # TensorCores get work once batches are large enough.
        lane_cap = max(1, 128 // Wp)
        G = 1
        for cand in range(min(lane_cap, B), 0, -1):
            if B % cand == 0:
                G = cand
                break
        if G == 1 and lane_cap > 1 and B > 1:
            G = min(lane_cap, B)          # accept a zero-padded tail
        num_groups = -(-B // G)
        B_pad = num_groups * G
        if B_pad != B:
            image = jnp.concatenate(
                [image, jnp.zeros((B_pad - B,) + image.shape[1:], image.dtype)],
                axis=0)

        consts = _build_constants(H, W, G, patch)
        hband, pool_r, pool_c, up_r, up_c, pool_r4 = (jnp.asarray(c) for c in consts)
        kernel = _make_fused_kernel(H, W, G, patch, mu_np, sinv_np)

        def const_spec(a):
            # Full-array block, same (0, 0) block index every grid step
            # => DMA'd into VMEM once, stays resident (no per-step re-DMA).
            return pl.BlockSpec(a.shape, lambda b: (0,) * a.ndim)

        scores = pl.pallas_call(
            kernel,
            out_shape=jax.ShapeDtypeStruct((B_pad, 1, 1), jnp.float32),
            grid=(num_groups,),
            in_specs=[
                pl.BlockSpec((G, 3, H, W), lambda b: (b, 0, 0, 0)),
                const_spec(hband), const_spec(pool_r), const_spec(pool_c),
                const_spec(up_r), const_spec(up_c), const_spec(pool_r4),
            ],
            out_specs=pl.BlockSpec((G, 1, 1), lambda b: (b, 0, 0)),
            scratch_shapes=[pltpu.VMEM((Hp, G * Wp), jnp.float32)],
            compiler_params=pltpu.CompilerParams(
                dimension_semantics=("parallel",),
                vmem_limit_bytes=vmem_limit,
            ),
        )(image, hband, pool_r, pool_c, up_r, up_c, pool_r4)

        per_image = scores[:B, 0, 0]      # lower is better
        loss = jnp.mean(per_image)        # as_loss=True -> scalar
        return loss, per_image

    return forward


if __name__ == "__main__":
    key = jax.random.PRNGKey(0)

    # Small shapes consistent with the module: batch=2 RGB images, 32x32.
    image = jax.random.uniform(key, (2, 3, 32, 32), dtype=jnp.float32)
    mu_np, sinv_np = make_template_params()

    forward = jax.jit(make_metric_forward(32, 32, mu_np, sinv_np, patch=8))
    loss, per_image = forward(image)
    jax.block_until_ready((loss, per_image))

    assert per_image.shape == (2,)
    assert bool(jnp.isfinite(loss))
    assert bool(jnp.all(jnp.isfinite(per_image)))
    print("KERNEL_OK")
</pallas_src>

<mosaic_0001>
module attributes {stable_mosaic.version = 11 : i64} {
  func.func @kernel(%arg0: i32, %arg1: memref<2x3x32x32xf32, #tpu.memory_space<vmem>>, %arg2: memref<76x70xf32, #tpu.memory_space<vmem>>, %arg3: memref<4x32xf32, #tpu.memory_space<vmem>>, %arg4: memref<70x8xf32, #tpu.memory_space<vmem>>, %arg5: memref<32x4xf32, #tpu.memory_space<vmem>>, %arg6: memref<8x70xf32, #tpu.memory_space<vmem>>, %arg7: memref<16x128xf32, #tpu.memory_space<vmem>>, %arg8: memref<2x1x1xf32, #tpu.memory_space<vmem>>, %arg9: memref<38x76xf32, #tpu.memory_space<vmem>>) attributes {dimension_semantics = [#tpu.dimension_semantics<parallel>], iteration_bounds = array<i64: 1>, scalar_prefetch = 0 : i64, scratch_operands = 1 : i64, tpu.core_type = #tpu.core_type<tc>, window_params = [{transform_indices = @transform_0, window_bounds = array<i64: 2, 3, 32, 32>}, {pipeline_mode = #tpu.pipeline_mode<synchronous>, transform_indices = @transform_1, window_bounds = array<i64: 76, 70>}, {pipeline_mode = #tpu.pipeline_mode<synchronous>, transform_indices = @transform_2, window_bounds = array<i64: 4, 32>}, {pipeline_mode = #tpu.pipeline_mode<synchronous>, transform_indices = @transform_3, window_bounds = array<i64: 70, 8>}, {pipeline_mode = #tpu.pipeline_mode<synchronous>, transform_indices = @transform_4, window_bounds = array<i64: 32, 4>}, {pipeline_mode = #tpu.pipeline_mode<synchronous>, transform_indices = @transform_5, window_bounds = array<i64: 8, 70>}, {pipeline_mode = #tpu.pipeline_mode<synchronous>, transform_indices = @transform_6, window_bounds = array<i64: 16, 128>}, {transform_indices = @transform_7, window_bounds = array<i64: 2, 1, 1>}]} {
    %c0 = arith.constant 0 : index
    %c0_0 = arith.constant 0 : index
    %c0_1 = arith.constant 0 : index
    %c0_2 = arith.constant 0 : index
    %0 = vector.load %arg1[%c0, %c0_0, %c0_1, %c0_2] : memref<2x3x32x32xf32, #tpu.memory_space<vmem>>, vector<2x3x32x32xf32>
    %1 = vector.extract_strided_slice %0 {offsets = [0, 0, 0, 0], sizes = [2, 1, 32, 32], strides = [1, 1, 1, 1]} : vector<2x3x32x32xf32> to vector<2x1x32x32xf32>
    %2 = vector.shape_cast %1 : vector<2x1x32x32xf32> to vector<2x32x32xf32>
    %cst = arith.constant 2.990000e-01 : f32
    %3 = vector.broadcast %cst : f32 to vector<2x32x32xf32>
    %4 = arith.mulf %3, %2 : vector<2x32x32xf32>
    %5 = vector.extract_strided_slice %0 {offsets = [0, 1, 0, 0], sizes = [2, 1, 32, 32], strides = [1, 1, 1, 1]} : vector<2x3x32x32xf32> to vector<2x1x32x32xf32>
    %6 = vector.shape_cast %5 : vector<2x1x32x32xf32> to vector<2x32x32xf32>
    %cst_3 = arith.constant 5.870000e-01 : f32
    %7 = vector.broadcast %cst_3 : f32 to vector<2x32x32xf32>
    %8 = arith.mulf %7, %6 : vector<2x32x32xf32>
    %9 = arith.addf %4, %8 : vector<2x32x32xf32>
    %10 = vector.extract_strided_slice %0 {offsets = [0, 2, 0, 0], sizes = [2, 1, 32, 32], strides = [1, 1, 1, 1]} : vector<2x3x32x32xf32> to vector<2x1x32x32xf32>
    %11 = vector.shape_cast %10 : vector<2x1x32x32xf32> to vector<2x32x32xf32>
    %cst_4 = arith.constant 1.140000e-01 : f32
    %12 = vector.broadcast %cst_4 : f32 to vector<2x32x32xf32>
    %13 = arith.mulf %12, %11 : vector<2x32x32xf32>
    %14 = arith.addf %9, %13 : vector<2x32x32xf32>
    %15 = vector.extract_strided_slice %14 {offsets = [0, 0, 0], sizes = [1, 32, 32], strides = [1, 1, 1]} : vector<2x32x32xf32> to vector<1x32x32xf32>
    %16 = vector.shape_cast %15 : vector<1x32x32xf32> to vector<32x32xf32>
    %c3 = arith.constant 3 : index
    %c3_5 = arith.constant 3 : index
    %17 = vector.load %arg9[%c3, %c3_5] : memref<38x76xf32, #tpu.memory_space<vmem>>, vector<32x32xf32>
    tpu.vector_store %arg9[%c3, %c3_5], %16 {strides = array<i32>} : memref<38x76xf32, #tpu.memory_space<vmem>>, vector<32x32xf32>,
    %18 = vector.extract_strided_slice %16 {offsets = [0, 0], sizes = [32, 1], strides = [1, 1]} : vector<32x32xf32> to vector<32x1xf32>
    %19 = vector.shape_cast %18 : vector<32x1xf32> to vector<32x1xf32>
    %20 = vector.broadcast %19 : vector<32x1xf32> to vector<32x3xf32>
    %c3_6 = arith.constant 3 : index
    %c0_7 = arith.constant 0 : index
    %21 = vector.load %arg9[%c3_6, %c0_7] : memref<38x76xf32, #tpu.memory_space<vmem>>, vector<32x3xf32>
    tpu.vector_store %arg9[%c3_6, %c0_7], %20 {strides = array<i32>} : memref<38x76xf32, #tpu.memory_space<vmem>>, vector<32x3xf32>,
    %22 = vector.extract_strided_slice %16 {offsets = [0, 31], sizes = [32, 1], strides = [1, 1]} : vector<32x32xf32> to vector<32x1xf32>
    %23 = vector.shape_cast %22 : vector<32x1xf32> to vector<32x1xf32>
    %24 = vector.broadcast %23 : vector<32x1xf32> to vector<32x3xf32>
    %c3_8 = arith.constant 3 : index
    %c35 = arith.constant 35 : index
    %25 = vector.load %arg9[%c3_8, %c35] : memref<38x76xf32, #tpu.memory_space<vmem>>, vector<32x3xf32>
    tpu.vector_store %arg9[%c3_8, %c35], %24 {strides = array<i32>} : memref<38x76xf32, #tpu.memory_space<vmem>>, vector<32x3xf32>,
    %26 = vector.extract_strided_slice %14 {offsets = [1, 0, 0], sizes = [1, 32, 32], strides = [1, 1, 1]} : vector<2x32x32xf32> to vector<1x32x32xf32>
    %27 = vector.shape_cast %26 : vector<1x32x32xf32> to vector<32x32xf32>
    %c3_9 = arith.constant 3 : index
    %c41 = arith.constant 41 : index
    %28 = vector.load %arg9[%c3_9, %c41] : memref<38x76xf32, #tpu.memory_space<vmem>>, vector<32x32xf32>
    tpu.vector_store %arg9[%c3_9, %c41], %27 {strides = array<i32>} : memref<38x76xf32, #tpu.memory_space<vmem>>, vector<32x32xf32>,
    %29 = vector.extract_strided_slice %27 {offsets = [0, 0], sizes = [32, 1], strides = [1, 1]} : vector<32x32xf32> to vector<32x1xf32>
    %30 = vector.shape_cast %29 : vector<32x1xf32> to vector<32x1xf32>
    %31 = vector.broadcast %30 : vector<32x1xf32> to vector<32x3xf32>
    %c3_10 = arith.constant 3 : index
    %c38 = arith.constant 38 : index
    %32 = vector.load %arg9[%c3_10, %c38] : memref<38x76xf32, #tpu.memory_space<vmem>>, vector<32x3xf32>
    tpu.vector_store %arg9[%c3_10, %c38], %31 {strides = array<i32>} : memref<38x76xf32, #tpu.memory_space<vmem>>, vector<32x3xf32>,
    %33 = vector.extract_strided_slice %27 {offsets = [0, 31], sizes = [32, 1], strides = [1, 1]} : vector<32x32xf32> to vector<32x1xf32>
    %34 = vector.shape_cast %33 : vector<32x1xf32> to vector<32x1xf32>
    %35 = vector.broadcast %34 : vector<32x1xf32> to vector<32x3xf32>
    %c3_11 = arith.constant 3 : index
    %c73 = arith.constant 73 : index
    %36 = vector.load %arg9[%c3_11, %c73] : memref<38x76xf32, #tpu.memory_space<vmem>>, vector<32x3xf32>
    tpu.vector_store %arg9[%c3_11, %c73], %35 {strides = array<i32>} : memref<38x76xf32, #tpu.memory_space<vmem>>, vector<32x3xf32>,
    %c3_12 = arith.constant 3 : index
    %c0_13 = arith.constant 0 : index
    %37 = vector.load %arg9[%c3_12, %c0_13] : memref<38x76xf32, #tpu.memory_space<vmem>>, vector<1x76xf32>
    %38 = vector.shape_cast %37 : vector<1x76xf32> to vector<1x76xf32>
    %39 = vector.broadcast %38 : vector<1x76xf32> to vector<3x76xf32>
    %c0_14 = arith.constant 0 : index
    %c0_15 = arith.constant 0 : index
    %40 = vector.load %arg9[%c0_14, %c0_15] : memref<38x76xf32, #tpu.memory_space<vmem>>, vector<3x76xf32>
    tpu.vector_store %arg9[%c0_14, %c0_15], %39 {strides = array<i32>} : memref<38x76xf32, #tpu.memory_space<vmem>>, vector<3x76xf32>,
    %c34 = arith.constant 34 : index
    %c0_16 = arith.constant 0 : index
    %41 = vector.load %arg9[%c34, %c0_16] : memref<38x76xf32, #tpu.memory_space<vmem>>, vector<1x76xf32>
    %42 = vector.shape_cast %41 : vector<1x76xf32> to vector<1x76xf32>
    %43 = vector.broadcast %42 : vector<1x76xf32> to vector<3x76xf32>
    %c35_17 = arith.constant 35 : index
    %c0_18 = arith.constant 0 : index
    %44 = vector.load %arg9[%c35_17, %c0_18] : memref<38x76xf32, #tpu.memory_space<vmem>>, vector<3x76xf32>
    tpu.vector_store %arg9[%c35_17, %c0_18], %43 {strides = array<i32>} : memref<38x76xf32, #tpu.memory_space<vmem>>, vector<3x76xf32>,
    %c0_19 = arith.constant 0 : index
    %c0_20 = arith.constant 0 : index
    %45 = vector.load %arg9[%c0_19, %c0_20] : memref<38x76xf32, #tpu.memory_space<vmem>>, vector<38x76xf32>
    %46 = arith.mulf %45, %45 : vector<38x76xf32>
    %47 = vector.extract_strided_slice %45 {offsets = [0, 0], sizes = [32, 76], strides = [1, 1]} : vector<38x76xf32> to vector<32x76xf32>
    %cst_21 = arith.constant 0.0125602009 : f32
    %48 = vector.broadcast %cst_21 : f32 to vector<32x76xf32>
    %49 = arith.mulf %48, %47 : vector<32x76xf32>
    %50 = vector.extract_strided_slice %46 {offsets = [0, 0], sizes = [32, 76], strides = [1, 1]} : vector<38x76xf32> to vector<32x76xf32>
    %cst_22 = arith.constant 0.0125602009 : f32
    %51 = vector.broadcast %cst_22 : f32 to vector<32x76xf32>
    %52 = arith.mulf %51, %50 : vector<32x76xf32>
    %53 = vector.extract_strided_slice %45 {offsets = [1, 0], sizes = [32, 76], strides = [1, 1]} : vector<38x76xf32> to vector<32x76xf32>
    %cst_23 = arith.constant 0.0788279623 : f32
    %54 = vector.broadcast %cst_23 : f32 to vector<32x76xf32>
    %55 = arith.mulf %54, %53 : vector<32x76xf32>
    %56 = arith.addf %49, %55 : vector<32x76xf32>
    %57 = vector.extract_strided_slice %46 {offsets = [1, 0], sizes = [32, 76], strides = [1, 1]} : vector<38x76xf32> to vector<32x76xf32>
    %cst_24 = arith.constant 0.0788279623 : f32
    %58 = vector.broadcast %cst_24 : f32 to vector<32x76xf32>
    %59 = arith.mulf %58, %57 : vector<32x76xf32>
    %60 = arith.addf %52, %59 : vector<32x76xf32>
    %61 = vector.extract_strided_slice %45 {offsets = [2, 0], sizes = [32, 76], strides = [1, 1]} : vector<38x76xf32> to vector<32x76xf32>
    %cst_25 = arith.constant 0.237296075 : f32
    %62 = vector.broadcast %cst_25 : f32 to vector<32x76xf32>
    %63 = arith.mulf %62, %61 : vector<32x76xf32>
    %64 = arith.addf %56, %63 : vector<32x76xf32>
    %65 = vector.extract_strided_slice %46 {offsets = [2, 0], sizes = [32, 76], strides = [1, 1]} : vector<38x76xf32> to vector<32x76xf32>
    %cst_26 = arith.constant 0.237296075 : f32
    %66 = vector.broadcast %cst_26 : f32 to vector<32x76xf32>
    %67 = arith.mulf %66, %65 : vector<32x76xf32>
    %68 = arith.addf %60, %67 : vector<32x76xf32>
    %69 = vector.extract_strided_slice %45 {offsets = [3, 0], sizes = [32, 76], strides = [1, 1]} : vector<38x76xf32> to vector<32x76xf32>
    %cst_27 = arith.constant 0.342631519 : f32
    %70 = vector.broadcast %cst_27 : f32 to vector<32x76xf32>
    %71 = arith.mulf %70, %69 : vector<32x76xf32>
    %72 = arith.addf %64, %71 : vector<32x76xf32>
    %73 = vector.extract_strided_slice %46 {offsets = [3, 0], sizes = [32, 76], strides = [1, 1]} : vector<38x76xf32> to vector<32x76xf32>
    %cst_28 = arith.constant 0.342631519 : f32
    %74 = vector.broadcast %cst_28 : f32 to vector<32x76xf32>
    %75 = arith.mulf %74, %73 : vector<32x76xf32>
    %76 = arith.addf %68, %75 : vector<32x76xf32>
    %77 = vector.extract_strided_slice %45 {offsets = [4, 0], sizes = [32, 76], strides = [1, 1]} : vector<38x76xf32> to vector<32x76xf32>
    %cst_29 = arith.constant 0.237296075 : f32
    %78 = vector.broadcast %cst_29 : f32 to vector<32x76xf32>
    %79 = arith.mulf %78, %77 : vector<32x76xf32>
    %80 = arith.addf %72, %79 : vector<32x76xf32>
    %81 = vector.extract_strided_slice %46 {offsets = [4, 0], sizes = [32, 76], strides = [1, 1]} : vector<38x76xf32> to vector<32x76xf32>
    %cst_30 = arith.constant 0.237296075 : f32
    %82 = vector.broadcast %cst_30 : f32 to vector<32x76xf32>
    %83 = arith.mulf %82, %81 : vector<32x76xf32>
    %84 = arith.addf %76, %83 : vector<32x76xf32>
    %85 = vector.extract_strided_slice %45 {offsets = [5, 0], sizes = [32, 76], strides = [1, 1]} : vector<38x76xf32> to vector<32x76xf32>
    %cst_31 = arith.constant 0.0788279623 : f32
    %86 = vector.broadcast %cst_31 : f32 to vector<32x76xf32>
    %87 = arith.mulf %86, %85 : vector<32x76xf32>
    %88 = arith.addf %80, %87 : vector<32x76xf32>
    %89 = vector.extract_strided_slice %46 {offsets = [5, 0], sizes = [32, 76], strides = [1, 1]} : vector<38x76xf32> to vector<32x76xf32>
    %cst_32 = arith.constant 0.0788279623 : f32
    %90 = vector.broadcast %cst_32 : f32 to vector<32x76xf32>
    %91 = arith.mulf %90, %89 : vector<32x76xf32>
    %92 = arith.addf %84, %91 : vector<32x76xf32>
    %93 = vector.extract_strided_slice %45 {offsets = [6, 0], sizes = [32, 76], strides = [1, 1]} : vector<38x76xf32> to vector<32x76xf32>
    %cst_33 = arith.constant 0.0125602009 : f32
    %94 = vector.broadcast %cst_33 : f32 to vector<32x76xf32>
    %95 = arith.mulf %94, %93 : vector<32x76xf32>
    %96 = arith.addf %88, %95 : vector<32x76xf32>
    %97 = vector.extract_strided_slice %46 {offsets = [6, 0], sizes = [32, 76], strides = [1, 1]} : vector<38x76xf32> to vector<32x76xf32>
    %cst_34 = arith.constant 0.0125602009 : f32
    %98 = vector.broadcast %cst_34 : f32 to vector<32x76xf32>
    %99 = arith.mulf %98, %97 : vector<32x76xf32>
    %100 = arith.addf %92, %99 : vector<32x76xf32>
    %c0_35 = arith.constant 0 : index
    %c0_36 = arith.constant 0 : index
    %101 = vector.load %arg2[%c0_35, %c0_36] : memref<76x70xf32, #tpu.memory_space<vmem>>, vector<76x70xf32>
    %cst_37 = arith.constant dense<0.000000e+00> : vector<32x70xf32>
    %102 = tpu.matmul %96, %101, %cst_37 {dimension_numbers = #tpu.dot_dimension_numbers<[1], [0], [0], [1], [0, 0, 1, 1], [], []>} : vector<32x76xf32>, vector<76x70xf32>, vector<32x70xf32> -> vector<32x70xf32>
    %cst_38 = arith.constant dense<0.000000e+00> : vector<32x70xf32>
    %103 = tpu.matmul %100, %101, %cst_38 {dimension_numbers = #tpu.dot_dimension_numbers<[1], [0], [0], [1], [0, 0, 1, 1], [], []>} : vector<32x76xf32>, vector<76x70xf32>, vector<32x70xf32> -> vector<32x70xf32>
    %104 = vector.extract_strided_slice %45 {offsets = [3, 3], sizes = [32, 70], strides = [1, 1]} : vector<38x76xf32> to vector<32x70xf32>
    %105 = arith.mulf %102, %102 : vector<32x70xf32>
    %106 = arith.subf %103, %105 : vector<32x70xf32>
    %cst_39 = arith.constant 0.000000e+00 : f32
    %107 = vector.broadcast %cst_39 : f32 to vector<32x70xf32>
    %108 = arith.maximumf %106, %107 : vector<32x70xf32>
    %109 = math.sqrt %108 : vector<32x70xf32>
    %110 = arith.subf %104, %102 : vector<32x70xf32>
    %cst_40 = arith.constant 0.00392156886 : f32
    %111 = vector.broadcast %cst_40 : f32 to vector<32x70xf32>
    %112 = arith.addf %109, %111 : vector<32x70xf32>
    %113 = tpu.reciprocal %112 {approx = true} : vector<32x70xf32> -> vector<32x70xf32>
    %114 = arith.mulf %112, %113 : vector<32x70xf32>
    %cst_41 = arith.constant 2.000000e+00 : f32
    %115 = vector.broadcast %cst_41 : f32 to vector<32x70xf32>
    %116 = arith.subf %115, %114 : vector<32x70xf32>
    %117 = arith.mulf %113, %116 : vector<32x70xf32>
    %118 = arith.mulf %110, %117 : vector<32x70xf32>
    %c0_42 = arith.constant 0 : index
    %c0_43 = arith.constant 0 : index
    %119 = vector.load %arg3[%c0_42, %c0_43] : memref<4x32xf32, #tpu.memory_space<vmem>>, vector<4x32xf32>
    %c0_44 = arith.constant 0 : index
    %c0_45 = arith.constant 0 : index
    %120 = vector.load %arg4[%c0_44, %c0_45] : memref<70x8xf32, #tpu.memory_space<vmem>>, vector<70x8xf32>
    %c0_46 = arith.constant 0 : index
    %c0_47 = arith.constant 0 : index
    %121 = vector.load %arg5[%c0_46, %c0_47] : memref<32x4xf32, #tpu.memory_space<vmem>>, vector<32x4xf32>
    %c0_48 = arith.constant 0 : index
    %c0_49 = arith.constant 0 : index
    %122 = vector.load %arg6[%c0_48, %c0_49] : memref<8x70xf32, #tpu.memory_space<vmem>>, vector<8x70xf32>
    %c0_50 = arith.constant 0 : index
    %c0_51 = arith.constant 0 : index
    %123 = vector.load %arg7[%c0_50, %c0_51] : memref<16x128xf32, #tpu.memory_space<vmem>>, vector<16x128xf32>
    %cst_52 = arith.constant dense<0.000000e+00> : vector<4x70xf32>
    %124 = tpu.matmul %119, %118, %cst_52 {dimension_numbers = #tpu.dot_dimension_numbers<[1], [0], [0], [1], [0, 0, 1, 1], [], []>} : vector<4x32xf32>, vector<32x70xf32>, vector<4x70xf32> -> vector<4x70xf32>
    %cst_53 = arith.constant dense<0.000000e+00> : vector<4x8xf32>
    %125 = tpu.matmul %124, %120, %cst_53 {dimension_numbers = #tpu.dot_dimension_numbers<[1], [0], [0], [1], [0, 0, 1, 1], [], []>} : vector<4x70xf32>, vector<70x8xf32>, vector<4x8xf32> -> vector<4x8xf32>
    %cst_54 = arith.constant dense<0.000000e+00> : vector<32x8xf32>
    %126 = tpu.matmul %121, %125, %cst_54 {dimension_numbers = #tpu.dot_dimension_numbers<[1], [0], [0], [1], [0, 0, 1, 1], [], []>} : vector<32x4xf32>, vector<4x8xf32>, vector<32x8xf32> -> vector<32x8xf32>
    %cst_55 = arith.constant dense<0.000000e+00> : vector<32x70xf32>
    %127 = tpu.matmul %126, %122, %cst_55 {dimension_numbers = #tpu.dot_dimension_numbers<[1], [0], [0], [1], [0, 0, 1, 1], [], []>} : vector<32x8xf32>, vector<8x70xf32>, vector<32x70xf32> -> vector<32x70xf32>
    %128 = arith.subf %118, %127 : vector<32x70xf32>
    %129 = arith.mulf %128, %128 : vector<32x70xf32>
    %130 = math.absf %128 : vector<32x70xf32>
    %131 = arith.mulf %129, %128 : vector<32x70xf32>
    %132 = arith.mulf %129, %129 : vector<32x70xf32>
    %133 = tpu.concatenate %129, %131, %132, %130 in 0 : vector<32x70xf32>, vector<32x70xf32>, vector<32x70xf32>, vector<32x70xf32> -> vector<128x70xf32>
    %cst_56 = arith.constant dense<0.000000e+00> : vector<16x70xf32>
    %134 = tpu.matmul %123, %133, %cst_56 {dimension_numbers = #tpu.dot_dimension_numbers<[1], [0], [0], [1], [0, 0, 1, 1], [], []>} : vector<16x128xf32>, vector<128x70xf32>, vector<16x70xf32> -> vector<16x70xf32>
    %cst_57 = arith.constant dense<0.000000e+00> : vector<16x8xf32>
    %135 = tpu.matmul %134, %120, %cst_57 {dimension_numbers = #tpu.dot_dimension_numbers<[1], [0], [0], [1], [0, 0, 1, 1], [], []>} : vector<16x70xf32>, vector<70x8xf32>, vector<16x8xf32> -> vector<16x8xf32>
    %136 = vector.extract_strided_slice %135 {offsets = [0, 0], sizes = [4, 8], strides = [1, 1]} : vector<16x8xf32> to vector<4x8xf32>
    %137 = vector.extract_strided_slice %135 {offsets = [4, 0], sizes = [4, 8], strides = [1, 1]} : vector<16x8xf32> to vector<4x8xf32>
    %138 = vector.extract_strided_slice %135 {offsets = [8, 0], sizes = [4, 8], strides = [1, 1]} : vector<16x8xf32> to vector<4x8xf32>
    %139 = vector.extract_strided_slice %135 {offsets = [12, 0], sizes = [4, 8], strides = [1, 1]} : vector<16x8xf32> to vector<4x8xf32>
    %140 = math.sqrt %136 : vector<4x8xf32>
    %cst_58 = arith.constant 9.99999997E-7 : f32
    %141 = vector.broadcast %cst_58 : f32 to vector<4x8xf32>
    %142 = arith.addf %136, %141 : vector<4x8xf32>
    %143 = math.sqrt %142 : vector<4x8xf32>
    %144 = arith.mulf %142, %143 : vector<4x8xf32>
    %145 = arith.divf %137, %144 : vector<4x8xf32>
    %146 = arith.mulf %142, %142 : vector<4x8xf32>
    %147 = arith.divf %138, %146 : vector<4x8xf32>
    %148 = arith.mulf %139, %139 : vector<4x8xf32>
    %149 = arith.divf %148, %142 : vector<4x8xf32>
    %cst_59 = arith.constant 0.176405236 : f32
    %150 = vector.broadcast %cst_59 : f32 to vector<4x8xf32>
    %151 = arith.subf %125, %150 : vector<4x8xf32>
    %cst_60 = arith.constant 0.0400157198 : f32
    %152 = vector.broadcast %cst_60 : f32 to vector<4x8xf32>
    %153 = arith.subf %140, %152 : vector<4x8xf32>
    %cst_61 = arith.constant 0.0978737995 : f32
    %154 = vector.broadcast %cst_61 : f32 to vector<4x8xf32>
    %155 = arith.subf %139, %154 : vector<4x8xf32>
    %cst_62 = arith.constant 0.224089324 : f32
    %156 = vector.broadcast %cst_62 : f32 to vector<4x8xf32>
    %157 = arith.subf %145, %156 : vector<4x8xf32>
    %cst_63 = arith.constant 0.186755806 : f32
    %158 = vector.broadcast %cst_63 : f32 to vector<4x8xf32>
    %159 = arith.subf %147, %158 : vector<4x8xf32>
    %cst_64 = arith.constant -0.0977277904 : f32
    %160 = vector.broadcast %cst_64 : f32 to vector<4x8xf32>
    %161 = arith.subf %149, %160 : vector<4x8xf32>
    %cst_65 = arith.constant 0.000000e+00 : f32
    %162 = vector.broadcast %cst_65 : f32 to vector<4x8xf32>
    %163 = arith.mulf %151, %151 : vector<4x8xf32>
    %cst_66 = arith.constant 0.753657579 : f32
    %164 = vector.broadcast %cst_66 : f32 to vector<4x8xf32>
    %165 = arith.mulf %164, %163 : vector<4x8xf32>
    %166 = arith.addf %162, %165 : vector<4x8xf32>
    %167 = arith.mulf %151, %153 : vector<4x8xf32>
    %cst_67 = arith.constant 0.0418704972 : f32
    %168 = vector.broadcast %cst_67 : f32 to vector<4x8xf32>
    %169 = arith.mulf %168, %167 : vector<4x8xf32>
    %170 = arith.addf %166, %169 : vector<4x8xf32>
    %171 = arith.mulf %151, %155 : vector<4x8xf32>
    %cst_68 = arith.constant 0.0466983244 : f32
    %172 = vector.broadcast %cst_68 : f32 to vector<4x8xf32>
    %173 = arith.mulf %172, %171 : vector<4x8xf32>
    %174 = arith.addf %170, %173 : vector<4x8xf32>
    %175 = arith.mulf %151, %157 : vector<4x8xf32>
    %cst_69 = arith.constant -0.396265239 : f32
    %176 = vector.broadcast %cst_69 : f32 to vector<4x8xf32>
    %177 = arith.mulf %176, %175 : vector<4x8xf32>
    %178 = arith.addf %174, %177 : vector<4x8xf32>
    %179 = arith.mulf %151, %159 : vector<4x8xf32>
    %cst_70 = arith.constant 0.0492239222 : f32
    %180 = vector.broadcast %cst_70 : f32 to vector<4x8xf32>
    %181 = arith.mulf %180, %179 : vector<4x8xf32>
    %182 = arith.addf %178, %181 : vector<4x8xf32>
    %183 = arith.mulf %151, %161 : vector<4x8xf32>
    %cst_71 = arith.constant 0.0702642798 : f32
    %184 = vector.broadcast %cst_71 : f32 to vector<4x8xf32>
    %185 = arith.mulf %184, %183 : vector<4x8xf32>
    %186 = arith.addf %182, %185 : vector<4x8xf32>
    %187 = arith.mulf %153, %153 : vector<4x8xf32>
    %cst_72 = arith.constant 0.723677575 : f32
    %188 = vector.broadcast %cst_72 : f32 to vector<4x8xf32>
    %189 = arith.mulf %188, %187 : vector<4x8xf32>
    %190 = arith.addf %186, %189 : vector<4x8xf32>
    %191 = arith.mulf %153, %155 : vector<4x8xf32>
    %cst_73 = arith.constant -0.0286218543 : f32
    %192 = vector.broadcast %cst_73 : f32 to vector<4x8xf32>
    %193 = arith.mulf %192, %191 : vector<4x8xf32>
    %194 = arith.addf %190, %193 : vector<4x8xf32>
    %195 = arith.mulf %153, %157 : vector<4x8xf32>
    %cst_74 = arith.constant -0.294426441 : f32
    %196 = vector.broadcast %cst_74 : f32 to vector<4x8xf32>
    %197 = arith.mulf %196, %195 : vector<4x8xf32>
    %198 = arith.addf %194, %197 : vector<4x8xf32>
    %199 = arith.mulf %153, %159 : vector<4x8xf32>
    %cst_75 = arith.constant 0.191948771 : f32
    %200 = vector.broadcast %cst_75 : f32 to vector<4x8xf32>
    %201 = arith.mulf %200, %199 : vector<4x8xf32>
    %202 = arith.addf %198, %201 : vector<4x8xf32>
    %203 = arith.mulf %153, %161 : vector<4x8xf32>
    %cst_76 = arith.constant -0.0295356642 : f32
    %204 = vector.broadcast %cst_76 : f32 to vector<4x8xf32>
    %205 = arith.mulf %204, %203 : vector<4x8xf32>
    %206 = arith.addf %202, %205 : vector<4x8xf32>
    %207 = arith.mulf %155, %155 : vector<4x8xf32>
    %cst_77 = arith.constant 0.405762583 : f32
    %208 = vector.broadcast %cst_77 : f32 to vector<4x8xf32>
    %209 = arith.mulf %208, %207 : vector<4x8xf32>
    %210 = arith.addf %206, %209 : vector<4x8xf32>
    %211 = arith.mulf %155, %157 : vector<4x8xf32>
    %cst_78 = arith.constant -0.100548238 : f32
    %212 = vector.broadcast %cst_78 : f32 to vector<4x8xf32>
    %213 = arith.mulf %212, %211 : vector<4x8xf32>
    %214 = arith.addf %210, %213 : vector<4x8xf32>
    %215 = arith.mulf %155, %159 : vector<4x8xf32>
    %cst_79 = arith.constant -0.0186450407 : f32
    %216 = vector.broadcast %cst_79 : f32 to vector<4x8xf32>
    %217 = arith.mulf %216, %215 : vector<4x8xf32>
    %218 = arith.addf %214, %217 : vector<4x8xf32>
    %219 = arith.mulf %155, %161 : vector<4x8xf32>
    %cst_80 = arith.constant -0.0343633704 : f32
    %220 = vector.broadcast %cst_80 : f32 to vector<4x8xf32>
    %221 = arith.mulf %220, %219 : vector<4x8xf32>
    %222 = arith.addf %218, %221 : vector<4x8xf32>
    %223 = arith.mulf %157, %157 : vector<4x8xf32>
    %cst_81 = arith.constant 0.433049649 : f32
    %224 = vector.broadcast %cst_81 : f32 to vector<4x8xf32>
    %225 = arith.mulf %224, %223 : vector<4x8xf32>
    %226 = arith.addf %222, %225 : vector<4x8xf32>
    %227 = arith.mulf %157, %159 : vector<4x8xf32>
    %cst_82 = arith.constant -0.0609966591 : f32
    %228 = vector.broadcast %cst_82 : f32 to vector<4x8xf32>
    %229 = arith.mulf %228, %227 : vector<4x8xf32>
    %230 = arith.addf %226, %229 : vector<4x8xf32>
    %231 = arith.mulf %157, %161 : vector<4x8xf32>
    %cst_83 = arith.constant 0.141223252 : f32
    %232 = vector.broadcast %cst_83 : f32 to vector<4x8xf32>
    %233 = arith.mulf %232, %231 : vector<4x8xf32>
    %234 = arith.addf %230, %233 : vector<4x8xf32>
    %235 = arith.mulf %159, %159 : vector<4x8xf32>
    %cst_84 = arith.constant 0.57017225 : f32
    %236 = vector.broadcast %cst_84 : f32 to vector<4x8xf32>
    %237 = arith.mulf %236, %235 : vector<4x8xf32>
    %238 = arith.addf %234, %237 : vector<4x8xf32>
    %239 = arith.mulf %159, %161 : vector<4x8xf32>
    %cst_85 = arith.constant -1.602230e-01 : f32
    %240 = vector.broadcast %cst_85 : f32 to vector<4x8xf32>
    %241 = arith.mulf %240, %239 : vector<4x8xf32>
    %242 = arith.addf %238, %241 : vector<4x8xf32>
    %243 = arith.mulf %161, %161 : vector<4x8xf32>
    %cst_86 = arith.constant 0.516974628 : f32
    %244 = vector.broadcast %cst_86 : f32 to vector<4x8xf32>
    %245 = arith.mulf %244, %243 : vector<4x8xf32>
    %246 = arith.addf %242, %245 : vector<4x8xf32>
    %cst_87 = arith.constant 0.000000e+00 : f32
    %247 = vector.broadcast %cst_87 : f32 to vector<4x8xf32>
    %248 = arith.maximumf %246, %247 : vector<4x8xf32>
    %249 = math.sqrt %248 : vector<4x8xf32>
    %250 = vector.extract_strided_slice %249 {offsets = [0, 0], sizes = [4, 4], strides = [1, 1]} : vector<4x8xf32> to vector<4x4xf32>
    %251 = vector.shape_cast %250 : vector<4x4xf32> to vector<1x4x4xf32>
    %cst_88 = arith.constant dense<0.000000e+00> : vector<1xf32>
    %252 = vector.multi_reduction <add>, %251, %cst_88 [1, 2] : vector<1x4x4xf32> to vector<1xf32>
    %253 = vector.shape_cast %252 : vector<1xf32> to vector<1x1x1xf32>
    %254 = vector.extract %253[0, 0, 0] : f32 from vector<1x1x1xf32>
    %255 = vector.broadcast %254 : f32 to vector<1x1xf32>
    %cst_89 = arith.constant 6.250000e-02 : f32
    %256 = vector.broadcast %cst_89 : f32 to vector<1x1xf32>
    %257 = arith.mulf %255, %256 : vector<1x1xf32>
    %c0_90 = arith.constant 0 : index
    %c0_91 = arith.constant 0 : index
    %c0_92 = arith.constant 0 : index
    %258 = vector.load %arg8[%c0_90, %c0_91, %c0_92] : memref<2x1x1xf32, #tpu.memory_space<vmem>>, vector<1x1x1xf32>
    %259 = vector.shape_cast %258 : vector<1x1x1xf32> to vector<1x1xf32>
    %260 = vector.shape_cast %257 : vector<1x1xf32> to vector<1x1x1xf32>
    tpu.vector_store %arg8[%c0_90, %c0_91, %c0_92], %260 {strides = array<i32>} : memref<2x1x1xf32, #tpu.memory_space<vmem>>, vector<1x1x1xf32>,
    %261 = vector.extract_strided_slice %249 {offsets = [0, 4], sizes = [4, 4], strides = [1, 1]} : vector<4x8xf32> to vector<4x4xf32>
    %262 = vector.shape_cast %261 : vector<4x4xf32> to vector<1x4x4xf32>
    %cst_93 = arith.constant dense<0.000000e+00> : vector<1xf32>
    %263 = vector.multi_reduction <add>, %262, %cst_93 [1, 2] : vector<1x4x4xf32> to vector<1xf32>
    %264 = vector.shape_cast %263 : vector<1xf32> to vector<1x1x1xf32>
    %265 = vector.extract %264[0, 0, 0] : f32 from vector<1x1x1xf32>
    %266 = vector.broadcast %265 : f32 to vector<1x1xf32>
    %cst_94 = arith.constant 6.250000e-02 : f32
    %267 = vector.broadcast %cst_94 : f32 to vector<1x1xf32>
    %268 = arith.mulf %266, %267 : vector<1x1xf32>
    %c1 = arith.constant 1 : index
    %c0_95 = arith.constant 0 : index
    %c0_96 = arith.constant 0 : index
    %269 = vector.load %arg8[%c1, %c0_95, %c0_96] : memref<2x1x1xf32, #tpu.memory_space<vmem>>, vector<1x1x1xf32>
    %270 = vector.shape_cast %269 : vector<1x1x1xf32> to vector<1x1xf32>
    %271 = vector.shape_cast %268 : vector<1x1xf32> to vector<1x1x1xf32>
    tpu.vector_store %arg8[%c1, %c0_95, %c0_96], %271 {strides = array<i32>} : memref<2x1x1xf32, #tpu.memory_space<vmem>>, vector<1x1x1xf32>,
    return
  }
  func.func @transform_0(%arg0: i32) -> (i32, i32, i32, i32) {
    %c0_i32 = arith.constant 0 : i32
    %c0_i32_0 = arith.constant 0 : i32
    %c0_i32_1 = arith.constant 0 : i32
    %c0_i32_2 = arith.constant 0 : i32
    return %arg0, %c0_i32, %c0_i32_0, %c0_i32_1 : i32, i32, i32, i32
  }
  func.func @transform_1(%arg0: i32) -> (i32, i32) {
    %c0_i32 = arith.constant 0 : i32
    %c0_i32_0 = arith.constant 0 : i32
    %c0_i32_1 = arith.constant 0 : i32
    return %c0_i32, %c0_i32_0 : i32, i32
  }
  func.func @transform_2(%arg0: i32) -> (i32, i32) {
    %c0_i32 = arith.constant 0 : i32
    %c0_i32_0 = arith.constant 0 : i32
    %c0_i32_1 = arith.constant 0 : i32
    return %c0_i32, %c0_i32_0 : i32, i32
  }
  func.func @transform_3(%arg0: i32) -> (i32, i32) {
    %c0_i32 = arith.constant 0 : i32
    %c0_i32_0 = arith.constant 0 : i32
    %c0_i32_1 = arith.constant 0 : i32
    return %c0_i32, %c0_i32_0 : i32, i32
  }
  func.func @transform_4(%arg0: i32) -> (i32, i32) {
    %c0_i32 = arith.constant 0 : i32
    %c0_i32_0 = arith.constant 0 : i32
    %c0_i32_1 = arith.constant 0 : i32
    return %c0_i32, %c0_i32_0 : i32, i32
  }
  func.func @transform_5(%arg0: i32) -> (i32, i32) {
    %c0_i32 = arith.constant 0 : i32
    %c0_i32_0 = arith.constant 0 : i32
    %c0_i32_1 = arith.constant 0 : i32
    return %c0_i32, %c0_i32_0 : i32, i32
  }
  func.func @transform_6(%arg0: i32) -> (i32, i32) {
    %c0_i32 = arith.constant 0 : i32
    %c0_i32_0 = arith.constant 0 : i32
    %c0_i32_1 = arith.constant 0 : i32
    return %c0_i32, %c0_i32_0 : i32, i32
  }
  func.func @transform_7(%arg0: i32) -> (i32, i32, i32) {
    %c0_i32 = arith.constant 0 : i32
    %c0_i32_0 = arith.constant 0 : i32
    %c0_i32_1 = arith.constant 0 : i32
    return %arg0, %c0_i32, %c0_i32_0 : i32, i32, i32
  }
}

</mosaic_0001>

<bundles_post_ra>
// kernel: forward.1
= control target key start
LH: loop header
LB: loop body
LE: loop exit
PB: predicated region body
PF: predicated region fallthrough
CT: control target
= control target key end

     0   :  { %12 = vsyncpa [#allocation4], 0  ;;  %s2948_s0 = inlined_call_operand.hbm [shape: f32[2,3,32,32], index: 0, kind: input, shape index: {}]   ;;  %s2949_s1 = inlined_call_operand.hbm [shape: f32[76,70], index: 1, kind: input, shape index: {}]   ;;  %s2950_s2 = inlined_call_operand.hbm [shape: f32[4,32], index: 2, kind: input, shape index: {}]   ;;  %s2951_s3 = inlined_call_operand.hbm [shape: f32[70,8], index: 3, kind: input, shape index: {}]   ;;  %s2952_s4 = inlined_call_operand.hbm [shape: f32[32,4], index: 4, kind: input, shape index: {}]   ;;  %s2953_s5 = inlined_call_operand.vmem [shape: f32[8,70], index: 5, kind: input, shape index: {}]   ;;  %s2954_s6 = inlined_call_operand.vmem [shape: f32[16,128], index: 6, kind: input, shape index: {}]   ;;  %s2955_s7 = inlined_call_operand.vmem [shape: f32[2,1,1], index: 7, kind: output, shape index: {}]  }
   0x1   :  { %13 = vsyncpa [#allocation6], 0 }
   0x2   :  { %14 = vsyncpa [#allocation9], 0  ;;  %s2419_s24 = smov [#allocation5]   ;;  %s2420_s26 = smov [#allocation8]  }
   0x3   :  { %s32_s25 = sshll.u32 %s2419_s24, 4  ;;  %s54_s27 = sshll.u32 %s2420_s26, 4  ;;  %s33_s25 = int_to_ptr.vmem [resolvable:$true] %s32_s25  ;;  %s2476_s27 = int_to_ptr.vmem [resolvable:$true] %s54_s27 }
   0x4   :  { %s2303_s30 = scalar_lea.hbm %s2949_s1, 1280 }
   0x5   :  { %p2304_p0 = scmp.ne.s32.totalorder %s2949_s1, %s2303_s30  ;;  %p2307_p1 = scmp.lt.u32.totalorder %s2303_s30, %s2949_s1 }
   0x7   :  { %p2309_p2 = pnand %p2307_p1, %p2304_p0 }
   0x9   :  { %2312 = shalt.err (!%p2309_p2)
}
   0xa   :  { %s2313_s12 = scalar_lea.vmem %s33_s25, 1280  ;;  %p2318_p4 = scmp.lt.s32.totalorder %s33_s25, %s33_s25 }
   0xb   :  { %p2314_p3 = scmp.ne.s32.totalorder %s33_s25, %s2313_s12  ;;  %p2319_p5 = scmp.lt.s32.totalorder %s2313_s12, %s2313_s12 }
   0xd   :  { %p2320_p6 = por %p2319_p5, %p2318_p4 }
   0xf   :  { %p2321_p7 = pnand %p2320_p6, %p2314_p3 }
  0x11   :  { %2324 = shalt.err (!%p2321_p7)
}
  0x12   :  { %s2421_s13 = smov 128   ;;  %s2422_s14 = smov 8  }
  0x13   :  { %38 = dma.hbm_to_vmem [thread:$0]  %s2949_s1, 1280, %s33_s25, [#allocation6], %s2421_s13, %s2421_s13, %s2422_s14  }
  0x14   :  { %s2325_s19 = scalar_lea.hbm %s2951_s3, 1152 }
  0x15   :  { %p2326_p8 = scmp.ne.s32.totalorder %s2951_s3, %s2325_s19  ;;  %p2329_p9 = scmp.lt.u32.totalorder %s2325_s19, %s2951_s3 }
  0x17   :  { %p2331_p10 = pnand %p2329_p9, %p2326_p8 }
  0x19   :  { %2334 = shalt.err (!%p2331_p10)
}
  0x1a   :  { %s2335_s24 = scalar_lea.vmem %s2476_s27, 1152  ;;  %p2340_p12 = scmp.lt.s32.totalorder %s2476_s27, %s2476_s27 }
  0x1b   :  { %p2336_p11 = scmp.ne.s32.totalorder %s2476_s27, %s2335_s24  ;;  %p2341_p13 = scmp.lt.s32.totalorder %s2335_s24, %s2335_s24 }
  0x1d   :  { %p2342_p0 = por %p2341_p13, %p2340_p12 }
  0x1f   :  { %p2343_p1 = pnand %p2342_p0, %p2336_p11 }
  0x21   :  { %2346 = shalt.err (!%p2343_p1)
}
  0x22   :  { %60 = dma.hbm_to_vmem [thread:$0]  %s2951_s3, 1152, %s2476_s27, [#allocation9], %s2421_s13, %s2421_s13, %s2422_s14  }
  0x23   :  { %s2423_s26 = smov [#allocation3]   ;;  %s2424_s29 = smov [#allocation7]  }
  0x24   :  { %s20_s28 = sshll.u32 %s2423_s26, 4  ;;  %s45_s30 = sshll.u32 %s2424_s29, 4  ;;  %s21_s28 = int_to_ptr.vmem [resolvable:$true] %s20_s28  ;;  %s46_s30 = int_to_ptr.vmem [resolvable:$true] %s45_s30 }
  0x25   :  { %s2347_s10 = scalar_lea.hbm %s2948_s0, 3072 }
  0x26   :  { %p2348_p2 = scmp.ne.s32.totalorder %s2948_s0, %s2347_s10  ;;  %p2351_p3 = scmp.lt.u32.totalorder %s2347_s10, %s2948_s0 }
  0x28   :  { %p2353_p4 = pnand %p2351_p3, %p2348_p2 }
  0x2a   :  { %2356 = shalt.err (!%p2353_p4)
}
  0x2b   :  { %s2357_s3 = scalar_lea.vmem %s21_s28, 3072  ;;  %p2362_p6 = scmp.lt.s32.totalorder %s21_s28, %s21_s28 }
  0x2c   :  { %p2358_p5 = scmp.ne.s32.totalorder %s21_s28, %s2357_s3  ;;  %p2363_p7 = scmp.lt.s32.totalorder %s2357_s3, %s2357_s3 }
  0x2e   :  { %p2364_p8 = por %p2363_p7, %p2362_p6 }
  0x30   :  { %p2365_p9 = pnand %p2364_p8, %p2358_p5 }
  0x32   :  { %2368 = shalt.err (!%p2365_p9)
}
  0x33   :  { %26 = dma.hbm_to_vmem [thread:$0]  %s2948_s0, 3072, %s21_s28, [#allocation4], %s2421_s13, %s2421_s13, %s2422_s14  }
  0x34   :  { %s2369_s20 = scalar_lea.hbm %s2950_s2, 64 }
  0x35   :  { %p2370_p10 = scmp.ne.s32.totalorder %s2950_s2, %s2369_s20  ;;  %p2373_p11 = scmp.lt.u32.totalorder %s2369_s20, %s2950_s2 }
  0x37   :  { %p2375_p12 = pnand %p2373_p11, %p2370_p10 }
  0x39   :  { %2378 = shalt.err (!%p2375_p12)
}
  0x3a   :  { %s2379_s1 = scalar_lea.vmem %s46_s30, 64  ;;  %p2384_p0 = scmp.lt.s32.totalorder %s46_s30, %s46_s30 }
  0x3b   :  { %p2380_p13 = scmp.ne.s32.totalorder %s46_s30, %s2379_s1  ;;  %p2385_p1 = scmp.lt.s32.totalorder %s2379_s1, %s2379_s1 }
  0x3d   :  { %p2386_p2 = por %p2385_p1, %p2384_p0 }
  0x3f   :  { %p2387_p3 = pnand %p2386_p2, %p2380_p13 }
  0x41   :  { %2390 = shalt.err (!%p2387_p3)
}
  0x42   :  { %48 = dma.hbm_to_vmem [thread:$0]  %s2950_s2, 64, %s46_s30, [#allocation6]  }
  0x43   :  { %s2425_s26 = smov [#allocation10]   ;;  %s2391_s9 = scalar_lea.hbm %s2952_s4, 512 }
  0x44   :  { %s66_s28 = sshll.u32 %s2425_s26, 4  ;;  %p2392_p4 = scmp.ne.s32.totalorder %s2952_s4, %s2391_s9  ;;  %s67_s28 = int_to_ptr.vmem [resolvable:$true] %s66_s28 }
  0x45   :  { %p2395_p5 = scmp.lt.u32.totalorder %s2391_s9, %s2952_s4 }
  0x47   :  { %p2397_p6 = pnand %p2395_p5, %p2392_p4 }
  0x49   :  { %2400 = shalt.err (!%p2397_p6)
}
  0x4a   :  { %s2401_s16 = scalar_lea.vmem %s67_s28, 512  ;;  %p2406_p8 = scmp.lt.s32.totalorder %s67_s28, %s67_s28 }
  0x4b   :  { %p2402_p7 = scmp.ne.s32.totalorder %s67_s28, %s2401_s16  ;;  %p2407_p9 = scmp.lt.s32.totalorder %s2401_s16, %s2401_s16 }
  0x4d   :  { %p2408_p10 = por %p2407_p9, %p2406_p8 }
  0x4f   :  { %p2409_p11 = pnand %p2408_p10, %p2402_p7 }
  0x51   :  { %2412 = shalt.err (!%p2409_p11)
}
  0x52   :  { %72 = dma.hbm_to_vmem [thread:$0]  %s2952_s4, 512, %s67_s28, [#allocation9], %s2421_s13, %s2421_s13, %s2422_s14  }
  0x53   :  { %2413 = dma.done.wait [#allocation4], 3072  }
  0x54   :  { %2414 = vsyncadd [#allocation4], 4294964224 }
  0x55   :  { %2415 = dma.done.wait [#allocation6], 1344  }
  0x56   :  { %2416 = vsyncadd [#allocation6], 4294965952 }
  0x57   :  { %2417 = dma.done.wait [#allocation9], 1664  }
  0x58   :  { %2418 = vsyncadd [#allocation9], 4294965632  ;;  %v2426_v0 = vmov 0   ;;  %v104_v1 = vld [vmem:[#allocation3 + $0x60] sm:$0xff]  ;;  %v93_v14 = vld [vmem:[#allocation3 + $0x8] sm:$0xff]  ;;  %v2427_v36 = vmov 31  }
  0x59   :  { %2216 = vset.pattern.permute.xlu1 %v2426_v0  ;;  %2215 = vset.pattern.permute.xlu0 %v2426_v0  ;;  %v108_v2 = vld [vmem:[#allocation3 + $0x80] sm:$0xff]  ;;  %v120_v4 = vmul.f32 0.299, %v104_v1  ;;  %v97_v15 = vld [vmem:[#allocation3 + $0x28] sm:$0xff]  ;;  %v117_v19 = vmul.f32 0.299, %v93_v14 }
  0x5a   :  { %v112_v3 = vld [vmem:[#allocation3 + $0xa0] sm:$0xff]  ;;  %v128_v5 = vmul.f32 0.587, %v108_v2  ;;  %v101_v16 = vld [vmem:[#allocation3 + $0x48] sm:$0xff]  ;;  %v125_v20 = vmul.f32 0.587, %v97_v15 }
  0x5b   :  { %v144_v6 = vmul.f32 0.114, %v112_v3  ;;  %v92_v7 = vld [vmem:[#allocation3] sm:$0xff]  ;;  %v95_v21 = vld [vmem:[#allocation3 + $0x18] sm:$0xff]  ;;  %v105_v25 = vld [vmem:[#allocation3 + $0x68] sm:$0xff]  ;;  %s2428_s4 = smov 3  }
  0x5c   :  { %v96_v8 = vld [vmem:[#allocation3 + $0x20] sm:$0xff]  ;;  %v136_v10 = vadd.f32 %v128_v5, %v120_v4  ;;  %v116_v11 = vmul.f32 0.299, %v92_v7  ;;  %v99_v22 = vld [vmem:[#allocation3 + $0x38] sm:$0xff]  ;;  %v119_v24 = vmul.f32 0.299, %v95_v21  ;;  %v133_v29 = vadd.f32 %v125_v20, %v117_v19 }
  0x5d   :  { %v100_v9 = vld [vmem:[#allocation3 + $0x40] sm:$0xff]  ;;  %v124_v12 = vmul.f32 0.587, %v96_v8  ;;  %v103_v23 = vld [vmem:[#allocation3 + $0x58] sm:$0xff]  ;;  %v127_v27 = vmul.f32 0.587, %v99_v22 }
  0x5e   :  { %v140_v13 = vmul.f32 0.114, %v100_v9  ;;  %v2557_v17 = vadd.f32 %v144_v6, %v136_v10  ;;  %v109_v28 = vld [vmem:[#allocation3 + $0x88] sm:$0xff]  ;;  %v141_v30 = vmul.f32 0.114, %v101_v16  ;;  %v107_v37 = vld [vmem:[#allocation3 + $0x78] sm:$0xff] }
  0x5f   :  { %v132_v18 = vadd.f32 %v124_v12, %v116_v11  ;;  %v135_v31 = vadd.f32 %v127_v27, %v119_v24  ;;  %v143_v32 = vmul.f32 0.114, %v103_v23  ;;  %v121_v33 = vmul.f32 0.299, %v105_v25  ;;  %v113_v35 = vld [vmem:[#allocation3 + $0xa8] sm:$0xff]  ;;  %v111_v38 = vld [vmem:[#allocation3 + $0x98] sm:$0xff] }
  0x60   :  { %241 = vperm.xlu1 %2216, %v2557_v17   ;;  %v129_v34 = vmul.f32 0.587, %v109_v28  ;;  %v149_v39 = vadd.f32 %v141_v30, %v133_v29  ;;  %v145_v42 = vmul.f32 0.114, %v113_v35  ;;  %v123_v43 = vmul.f32 0.299, %v107_v37 }
  0x61   :  { %v148_v26 = vadd.f32 %v140_v13, %v132_v18  ;;  %v151_v40 = vadd.f32 %v143_v32, %v135_v31  ;;  %v131_v44 = vmul.f32 0.587, %v111_v38  ;;  %v115_v45 = vld [vmem:[#allocation3 + $0xb8] sm:$0xff]  ;;  %v94_v46 = vld [vmem:[#allocation3 + $0x10] sm:$0xff]  ;;  %s2429_s13 = smov 41   ;;  %v595_v3 = vld [vmem:[#allocation5] sm:$0xff] }
  0x62   :  { %v137_v41 = vadd.f32 %v129_v34, %v121_v33  ;;  %v98_v47 = vld [vmem:[#allocation3 + $0x30] sm:$0xff]  ;;  %v147_v50 = vmul.f32 0.114, %v115_v45  ;;  %v118_v51 = vmul.f32 0.299, %v94_v46  ;;  %v596_v4 = vld [vmem:[#allocation5 + $0x8] sm:$0xff] }
  0x63   :  { %178 = vperm.xlu0 %2215, %v148_v26   ;;  %v139_v49 = vadd.f32 %v131_v44, %v123_v43  ;;  %v126_v52 = vmul.f32 0.587, %v98_v47  ;;  %v102_v53 = vld [vmem:[#allocation3 + $0x50] sm:$0xff]  ;;  %v2084_v6 = vpack.c.bf16 %v596_v4, %v595_v3  ;;  %v598_v7 = vld [vmem:[#allocation5 + $0x18] sm:$0xff]  ;;  %v599_v9 = vld [vmem:[#allocation5 + $0x20] sm:$0xff]  ;;  %vm478_vm0 = vcmask 1043456  }
  0x64   :  { %2217 = vset.pattern.permute.xlu1 %v2427_v36  ;;  %v153_v48 = vadd.f32 %v145_v42, %v137_v41  ;;  %v142_v56 = vmul.f32 0.114, %v102_v53  ;;  %v106_v57 = vld [vmem:[#allocation3 + $0x70] sm:$0xff]  ;;  %v600_v10 = vld [vmem:[#allocation5 + $0x28] sm:$0xff]  ;;  %v602_v12 = vld [vmem:[#allocation5 + $0x38] sm:$0xff]  ;;  %vm2430_vm1 = vmmov 1  }
  0x65   :  { %262 = vperm.xlu1 %2217, %v2557_v17   ;;  %v155_v54 = vadd.f32 %v147_v50, %v139_v49  ;;  %v134_v55 = vadd.f32 %v126_v52, %v118_v51  ;;  %v110_v58 = vld [vmem:[#allocation3 + $0x90] sm:$0xff]  ;;  %v122_v59 = vmul.f32 0.299, %v106_v57  ;;  %2085 = vmatprep.subr.bf16.mxu0 %v2084_v6  ;;  %v603_v14 = vld [vmem:[#allocation5 + $0x40] sm:$0xff]  ;;  %v604_v15 = vld [vmem:[#allocation5 + $0x48] sm:$0xf] }
  0x66   :  { %v130_v60 = vmul.f32 0.587, %v110_v58  ;;  %v114_v62 = vld [vmem:[#allocation3 + $0xb0] sm:$0xff]  ;;  %2107 = vmatprep.subr.bf16.mxu1 %v2084_v6  ;;  %2087 = vmatpush3.bf16.msra.mxu0 %v2084_v6  ;;  %v2100_v16 = vpack.c.bf16 %v604_v15, %v603_v14  ;;  %vm2101_vm2 = vmpackc.low %vm478_vm0, %vm2430_vm1  ;;  %vm172_vm3 = vcmask 285720   ;;  %vm193_vm4 = vcmask 23552   ;;  %s2434_s14 = smov 125  }
  0x67   :  { %160 = vrot.lane.b32.xlu0 %v148_v26, %s2428_s4  ;;  %v150_v61 = vadd.f32 %v142_v56, %v134_v55  ;;  %v146_v1 = vmul.f32 0.114, %v114_v62  ;;  %v597_v5 = vld [vmem:[#allocation5 + $0x10] sm:$0xff]  ;;  %2109 = vmatpush3.bf16.msra.mxu1 %v2084_v6  ;;  %vm214_vm5 = vcmask 310552   ;;  %vm235_vm6 = vcmask 597320  }
  0x68   :  { %v138_v63 = vadd.f32 %v130_v60, %v122_v59  ;;  %v2088_v8 = vpack.c.bf16 %v598_v7, %v597_v5  ;;  %v601_v11 = vld [vmem:[#allocation5 + $0x30] sm:$0xff]  ;;  %vm256_vm7 = vcmask 335152   ;;  %vm277_vm8 = vcmask 622152  }
  0x69   :  { %2218 = vset.pattern.permute.xlu1 %v2426_v0  ;;  %v2096_v13 = vpack.c.bf16 %v602_v12, %v601_v11  ;;  %vm287_vm9 = vcmask 616448   ;;  %vm323_vm10 = vcmask 1046528   ;;  %vm378_vm11 = vcmask 1045504  }
  0x6a   :  { %190 = vperm.xlu1 %2218, %v151_v40   ;;  %v154_v2 = vadd.f32 %v146_v1, %v138_v63  ;;  %2089 = vmatprep.subr.bf16.mxu0 %v2088_v8  ;;  %vm433_vm12 = vcmask 1044480   ;;  %vm513_vm13 = vcmask 1042432   ;;  %vm554_vm14 = vcmask 1041408  }
  0x6b   :  { %182 = vperm.xlu0 %2215, %v149_v39   ;;  %2111 = vmatprep.subr.bf16.mxu1 %v2088_v8  ;;  %vm605_vm15 = vcmask 621568  }
  0x6c   :  { %2091 = vmatpush3.bf16.msra.mxu0 %v2088_v8  ;;  %2113 = vmatpush3.bf16.msra.mxu1 %v2088_v8 }
  0x6e   :  { %2219 = vset.pattern.permute.xlu1 %v2427_v36 }
  0x6f   :  { %245 = vperm.xlu0 %2215, %v153_v48   ;;  %211 = vperm.xlu1 %2219, %v151_v40  }
  0x73   :  { %2222 = vset.pattern.permute.xlu0 %v2427_v36  ;;  %2220 = vset.pattern.permute.xlu1 %v2426_v0 }
  0x74   :  { %199 = vperm.xlu0 %2222, %v148_v26   ;;  %253 = vperm.xlu1 %2220, %v155_v54  }
  0x78   :  { %203 = vperm.xlu0 %2222, %v149_v39   ;;  %186 = vperm.xlu1 %2220, %v150_v61  }
  0x7c   :  { %207 = vperm.xlu0 %2222, %v150_v61   ;;  %223 = vrot.lane.b32.xlu1 %v2557_v17, %s2429_s13 }
  0x7d   :  { %2221 = vset.pattern.permute.xlu1 %v2427_v36 }
  0x80   :  { %270 = vperm.xlu0 %2222, %v154_v2   ;;  %274 = vperm.xlu1 %2221, %v155_v54  }
  0x84   :  { %164 = vrot.lane.b32.xlu0 %v150_v61, %s2428_s4  ;;  %166 = vrot.lane.b32.xlu1 %v151_v40, %s2428_s4 }
  0x85   :  { %2223 = vset.pattern.permute.xlu1 %v2426_v0  ;;  %v2092_v0 = vpack.c.bf16 %v600_v10, %v599_v9 }
  0x87   :  { %2093 = vmatprep.subr.bf16.mxu0 %v2092_v0  ;;  %2115 = vmatprep.subr.bf16.mxu1 %v2092_v0 }
  0x88   :  { %227 = vrot.lane.b32.xlu0 %v154_v2, %s2429_s13  ;;  %249 = vperm.xlu1 %2223, %v154_v2  }
  0x89   :  { %2095 = vmatpush3.bf16.msra.mxu0 %v2092_v0  ;;  %2117 = vmatpush3.bf16.msra.mxu1 %v2092_v0 }
  0x8a   :  { %2097 = vmatprep.subr.bf16.mxu0 %v2096_v13  ;;  %2119 = vmatprep.subr.bf16.mxu1 %v2096_v13 }
  0x8c   :  { %2224 = vset.pattern.permute.xlu1 %v2427_v36 }
  0x8d   :  { %266 = vperm.xlu1 %2224, %v153_v48   ;;  %2099 = vmatpush3.bf16.msra.mxu0 %v2096_v13 }
  0x8e   :  { %2121 = vmatpush3.bf16.msra.mxu1 %v2096_v13  ;;  %2102 = vmatprep.subr.msk.bf16.mxu0 %vm2101_vm2, %v2100_v16 }
  0x8f   :  { %2124 = vmatprep.subr.msk.bf16.mxu1 %vm2101_vm2, %v2100_v16 }
  0x91   :  { %162 = vrot.lane.b32.xlu1 %v149_v39, %s2428_s4  ;;  %2105 = vmatpush3.bf16.msk.msra.mxu0 %vm2101_vm2, %v2100_v16 }
  0x92   :  { %2127 = vmatpush3.bf16.msk.msra.mxu1 %vm2101_vm2, %v2100_v16 }
  0x95   :  { %229 = vrot.lane.b32.xlu1 %v155_v54, %s2429_s13 }
  0x99   :  { %225 = vrot.lane.b32.xlu1 %v153_v48, %s2429_s13 }
  0xdf   :  { %v242_v17 = vpop.permute.xlu1 %241 }
  0xe2   :  { %v179_v18 = vpop.permute.xlu0 %178 }
  0xe4   :  { %v263_v19 = vpop.permute.xlu1 %262 }
  0xe6   :  { %v161_v20 = vpop.permute.xlu0 %160 }
  0xe7   :  { %173 = vst.msk [vmem:[#allocation2 + $0x3] sm:$0xff] %vm172_vm3, %v161_v20 }
  0xe8   :  { %194 = vst.msk [vmem:[#allocation2 + $0x3] sm:$0xff] %vm193_vm4, %v179_v18 }
  0xe9   :  { %v191_v22 = vpop.permute.xlu1 %190 }
  0xea   :  { %v183_v21 = vpop.permute.xlu0 %182 }
  0xee   :  { %v246_v23 = vpop.permute.xlu0 %245  ;;  %v212_v24 = vpop.permute.xlu1 %211 }
  0xf3   :  { %v200_v25 = vpop.permute.xlu0 %199  ;;  %v254_v26 = vpop.permute.xlu1 %253 }
  0xf4   :  { %215 = vst.msk [vmem:[#allocation2 + $0x3] sm:$0xff] %vm214_vm5, %v200_v25 }
  0xf7   :  { %v204_v27 = vpop.permute.xlu0 %203  ;;  %v187_v28 = vpop.permute.xlu1 %186 }
  0xfb   :  { %v208_v29 = vpop.permute.xlu0 %207  ;;  %v224_v30 = vpop.permute.xlu1 %223 }
  0xfc   :  { %236 = vst.msk [vmem:[#allocation2 + $0x3] sm:$0xff] %vm235_vm6, %v224_v30 }
  0xfd   :  { %257 = vst.msk [vmem:[#allocation2 + $0x3] sm:$0xff] %vm256_vm7, %v242_v17 }
  0xfe   :  { %278 = vst.msk [vmem:[#allocation2 + $0x3] sm:$0xff] %vm277_vm8, %v263_v19 }
  0xff   :  { %v271_v31 = vpop.permute.xlu0 %270  ;;  %v275_v32 = vpop.permute.xlu1 %274 }
 0x103   :  { %v165_v33 = vpop.permute.xlu0 %164  ;;  %v167_v34 = vpop.permute.xlu1 %166 }
 0x104   :  { %175 = vst.msk [vmem:[#allocation2 + $0x13] sm:$0xff] %vm172_vm3, %v165_v33  ;;  %176 = vst.msk [vmem:[#allocation2 + $0x1b] sm:$0xff] %vm172_vm3, %v167_v34 }
 0x105   :  { %196 = vst.msk [vmem:[#allocation2 + $0x13] sm:$0xff] %vm193_vm4, %v187_v28  ;;  %v1812_v35 = vld [vmem:[#allocation2 + $0x3] ss:$0 sm:$0xff]  ;;  %197 = vst.msk [vmem:[#allocation2 + $0x1b] sm:$0xff] %vm193_vm4, %v191_v22 }
 0x106   :  { %217 = vst.msk [vmem:[#allocation2 + $0x13] sm:$0xff] %vm214_vm5, %v208_v29  ;;  %218 = vst.msk [vmem:[#allocation2 + $0x1b] sm:$0xff] %vm214_vm5, %v212_v24 }
 0x107   :  { %288 = vst.msk [vmem:[#allocation2] sm:$0x7] %vm287_vm9, %v1812_v35  ;;  %v228_v36 = vpop.permute.xlu0 %227  ;;  %v250_v37 = vpop.permute.xlu1 %249 }
 0x108   :  { %238 = vst.msk [vmem:[#allocation2 + $0x13] sm:$0xff] %vm235_vm6, %v228_v36 }
 0x109   :  { %259 = vst.msk [vmem:[#allocation2 + $0x13] sm:$0xff] %vm256_vm7, %v250_v37 }
 0x10a   :  { %280 = vst.msk [vmem:[#allocation2 + $0x13] sm:$0xff] %vm277_vm8, %v271_v31 }
 0x10c   :  { %v267_v38 = vpop.permute.xlu1 %266 }
 0x10e   :  { %v2590_v41 = vld [vmem:[#allocation2] sm:$0xff] }
 0x10f   :  { %v300_v43 = vmul.f32 %v2590_v41, %v2590_v41  ;;  %v2598_v44 = vmul.f32 0.07882796, %v2590_v41  ;;  %v2601_v45 = vmul.f32 0.23729607, %v2590_v41  ;;  %v2605_v46 = vmul.f32 0.012560201, %v2590_v41 }
 0x110   :  { %v163_v39 = vpop.permute.xlu1 %162  ;;  %v2608_v47 = vmul.f32 0.34263152, %v2590_v41 }
 0x111   :  { %174 = vst.msk [vmem:[#allocation2 + $0xb] sm:$0xff] %vm172_vm3, %v163_v39  ;;  %v2611_v48 = vmul.f32 0.07882796, %v300_v43  ;;  %v324_v49 = vrot.slane %v2598_v44, 1  ;;  %v379_v50 = vrot.slane %v2601_v45, 2  ;;  %v479_v51 = vrot.slane %v2601_v45, 4 }
 0x112   :  { %195 = vst.msk [vmem:[#allocation2 + $0xb] sm:$0xff] %vm193_vm4, %v183_v21  ;;  %v2616_v52 = vmul.f32 0.23729607, %v300_v43  ;;  %v434_v54 = vrot.slane %v2608_v47, 3  ;;  %v514_v55 = vrot.slane %v2598_v44, 5  ;;  %v555_v56 = vrot.slane %v2605_v46, 6 }
 0x113   :  { %216 = vst.msk [vmem:[#allocation2 + $0xb] sm:$0xff] %vm214_vm5, %v204_v27  ;;  %v2630_v60 = vmul.f32 0.012560201, %v300_v43  ;;  %v351_v62 = vrot.slane %v2611_v48, 1  ;;  %v2636_v63 = vmul.f32 0.34263152, %v300_v43 }
 0x114   :  { %v230_v40 = vpop.permute.xlu1 %229  ;;  %v531_v1 = vrot.slane %v2611_v48, 5  ;;  %v406_v4 = vrot.slane %v2616_v52, 2 }
 0x115   :  { %239 = vst.msk [vmem:[#allocation2 + $0x1b] sm:$0xff] %vm235_vm6, %v230_v40 }
 0x116   :  { %260 = vst.msk [vmem:[#allocation2 + $0x1b] sm:$0xff] %vm256_vm7, %v254_v26 }
 0x117   :  { %281 = vst.msk [vmem:[#allocation2 + $0x1b] sm:$0xff] %vm277_vm8, %v275_v32 }
 0x118   :  { %v226_v42 = vpop.permute.xlu1 %225 }
 0x119   :  { %237 = vst.msk [vmem:[#allocation2 + $0xb] sm:$0xff] %vm235_vm6, %v226_v42 }
 0x11a   :  { %258 = vst.msk [vmem:[#allocation2 + $0xb] sm:$0xff] %vm256_vm7, %v246_v23 }
 0x11b   :  { %279 = vst.msk [vmem:[#allocation2 + $0xb] sm:$0xff] %vm277_vm8, %v267_v38 }
 0x11e   :  { %v1813_v53 = vld [vmem:[#allocation2 + $0x22] ss:$0 sm:$0xff]  ;;  %v2621_v57 = vld [vmem:[#allocation2 + $0x18] sm:$0xff] }
 0x11f   :  { %294 = vst.msk [vmem:[#allocation2 + $0x23] sm:$0x7] %vm287_vm9, %v1813_v53  ;;  %v2625_v58 = vmul.f32 0.07882796, %v2621_v57  ;;  %v2628_v59 = vmul.f32 0.23729607, %v2621_v57  ;;  %v2646_v5 = vmul.f32 %v2621_v57, %v2621_v57 }
 0x120   :  { %v2633_v61 = vmul.f32 0.34263152, %v2621_v57  ;;  %v2641_v3 = vmul.f32 0.012560201, %v2621_v57  ;;  %vm2432_vm9 = vmmov 0  }
 0x121   :  { %v329_v2 = vrot.slane %v2625_v58, 1  ;;  %v384_v8 = vrot.slane %v2628_v59, 2  ;;  %v484_v10 = vrot.slane %v2628_v59, 4  ;;  %v519_v0 = vrot.slane %v2625_v58, 5 }
 0x122   :  { %v2648_v6 = vld [vmem:[#allocation2 + $0x8] sm:$0xff]  ;;  %v2650_v7 = vld [vmem:[#allocation2 + $0x10] sm:$0xff]  ;;  %v439_v9 = vrot.slane %v2633_v61, 3  ;;  %v560_v19 = vrot.slane %v2641_v3, 6  ;;  %v2664_v20 = vmul.f32 0.07882796, %v2646_v5 }
 0x123   :  { %v306_v11 = vmul.f32 0.012560201, %v2648_v6  ;;  %v314_v12 = vmul.f32 0.07882796, %v2648_v6  ;;  %v315_v13 = vmul.f32 0.07882796, %v2650_v7  ;;  %v301_v24 = vmul.f32 %v2648_v6, %v2648_v6 }
 0x124   :  { %v369_v14 = vmul.f32 0.23729607, %v2648_v6  ;;  %v370_v15 = vmul.f32 0.23729607, %v2650_v7  ;;  %v424_v16 = vmul.f32 0.34263152, %v2648_v6  ;;  %v2672_v28 = vmul.f32 %v2650_v7, %v2650_v7 }
 0x125   :  { %v325_v17 = vrot.slane %v314_v12, 1  ;;  %v327_v18 = vrot.slane %v315_v13, 1  ;;  %v515_v27 = vrot.slane %v314_v12, 5  ;;  %v556_v32 = vrot.slane %v306_v11, 6 }
 0x126   :  { %v380_v21 = vrot.slane %v369_v14, 2  ;;  %v382_v22 = vrot.slane %v370_v15, 2  ;;  %v435_v23 = vrot.slane %v424_v16, 3  ;;  %v480_v31 = vrot.slane %v369_v14, 4  ;;  %v2681_v37 = vld [vmem:[#allocation2 + $0x20] sm:$0x3f] }
 0x127   :  { %v326_v25 = vsel %vm323_vm10, %v324_v49, %v325_v17  ;;  %v328_v26 = vsel %vm323_vm10, %v325_v17, %v327_v18  ;;  %v307_v35 = vmul.f32 0.012560201, %v2650_v7  ;;  %v330_v36 = vsel %vm323_vm10, %v327_v18, %v329_v2 }
 0x128   :  { %v337_v29 = vadd.f32 %v326_v25, %v2605_v46  ;;  %v338_v30 = vadd.f32 %v328_v26, %v306_v11  ;;  %v381_v33 = vsel %vm378_vm11, %v379_v50, %v380_v21  ;;  %v383_v34 = vsel %vm378_vm11, %v380_v21, %v382_v22 }
 0x129   :  { %v436_v39 = vsel %vm433_vm12, %v434_v54, %v435_v23  ;;  %v425_v40 = vmul.f32 0.34263152, %v2650_v7  ;;  %v482_v42 = vrot.slane %v370_v15, 4  ;;  %v339_v47 = vadd.f32 %v330_v36, %v307_v35 }
 0x12a   :  { %v392_v38 = vadd.f32 %v381_v33, %v337_v29  ;;  %v393_v43 = vadd.f32 %v383_v34, %v338_v30  ;;  %v517_v49 = vrot.slane %v315_v13, 5  ;;  %v558_v50 = vrot.slane %v307_v35, 6 }
 0x12b   :  { %v437_v11 = vrot.slane %v425_v40, 3  ;;  %v2686_v12 = vmul.f32 0.07882796, %v2681_v37  ;;  %v385_v14 = vsel %vm378_vm11, %v382_v22, %v384_v8  ;;  %v481_v54 = vsel %vm478_vm0, %v479_v51, %v480_v31 }
 0x12c   :  { %v447_v53 = vadd.f32 %v436_v39, %v392_v38  ;;  %v516_v15 = vsel %vm513_vm13, %v514_v55, %v515_v27  ;;  %v557_v13 = vsel %vm554_vm14, %v555_v56, %v556_v32  ;;  %v394_v16 = vadd.f32 %v385_v14, %v339_v47 }
 0x12d   :  { %v438_v18 = vsel %vm433_vm12, %v435_v23, %v437_v11  ;;  %v483_v21 = vsel %vm478_vm0, %v480_v31, %v482_v42  ;;  %v440_v45 = vsel %vm433_vm12, %v437_v11, %v439_v9  ;;  %v518_v51 = vsel %vm513_vm13, %v515_v27, %v517_v49 }
 0x12e   :  { %v492_v17 = vadd.f32 %v481_v54, %v447_v53  ;;  %v448_v22 = vadd.f32 %v438_v18, %v393_v43  ;;  %v559_v44 = vsel %vm554_vm14, %v556_v32, %v558_v50  ;;  %v449_v55 = vadd.f32 %v440_v45, %v394_v16 }
 0x12f   :  { %v331_v46 = vrot.slane %v2686_v12, 1  ;;  %v485_v56 = vsel %vm478_vm0, %v482_v42, %v484_v10  ;;  %v520_v23 = vsel %vm513_vm13, %v517_v49, %v519_v0  ;;  %v2714_v30 = vmul.f32 0.07882796, %v301_v24 }
 0x130   :  { %v527_v25 = vadd.f32 %v516_v15, %v492_v17  ;;  %v493_v26 = vadd.f32 %v483_v21, %v448_v22  ;;  %v494_v29 = vadd.f32 %v485_v56, %v449_v55  ;;  %v2717_v27 = vmul.f32 0.07882796, %v2672_v28 }
 0x131   :  { %v397_v32 = vmul.f32 0.23729607, %v301_v24  ;;  %v2720_v33 = vmul.f32 0.23729607, %v2672_v28  ;;  %v452_v34 = vmul.f32 0.34263152, %v301_v24  ;;  %v561_v40 = vsel %vm554_vm14, %v558_v50, %v560_v19 }
 0x132   :  { %v568_v31 = vadd.f32 %v557_v13, %v527_v25  ;;  %v528_v35 = vadd.f32 %v518_v51, %v493_v26  ;;  %v529_v36 = vadd.f32 %v520_v23, %v494_v29  ;;  %v352_v38 = vrot.slane %v2714_v30, 1 }
 0x133   :  { %v354_v39 = vrot.slane %v2717_v27, 1  ;;  %v310_v42 = vmul.f32 0.012560201, %v301_v24  ;;  %v407_v43 = vrot.slane %v397_v32, 2  ;;  %v409_v47 = vrot.slane %v2720_v33, 2 }
 0x134   :  { %1948 = vmatprep.mubr.msk.f32.mxu0 %vm605_vm15, %v568_v31  ;;  %v569_v49 = vadd.f32 %v559_v44, %v528_v35  ;;  %v353_v53 = vsel %vm323_vm10, %v351_v62, %v352_v38  ;;  %v462_v14 = vrot.slane %v452_v34, 3  ;;  %v570_v54 = vadd.f32 %v561_v40, %v529_v36 }
 0x135   :  { %v355_v11 = vsel %vm323_vm10, %v352_v38, %v354_v39  ;;  %v364_v15 = vadd.f32 %v353_v53, %v2630_v60  ;;  %v497_v16 = vrot.slane %v397_v32, 4  ;;  %v408_v24 = vsel %vm378_vm11, %v406_v4, %v407_v43 }
 0x136   :  { %v365_v13 = vadd.f32 %v355_v11, %v310_v42  ;;  %1949 = vmatmul.mubr.msk.f32.vlgmr.msra.gmra.mrb[0].mxu0 %vm605_vm15, %v569_v49  ;;  %v461_v50 = vrot.slane %v2636_v63, 3  ;;  %v496_v17 = vrot.slane %v2616_v52, 4  ;;  %v578_v62 = vrot.slane %v2630_v60, 6 }
 0x137   :  { %v332_v18 = vsel %vm323_vm10, %v329_v2, %v331_v46  ;;  %1951 = vmatprep.mubr.msk.f32.mxu0 %vm605_vm15, %v570_v54  ;;  %v419_v21 = vadd.f32 %v408_v24, %v364_v15  ;;  %v532_v45 = vrot.slane %v2714_v30, 5  ;;  %v311_v22 = vmul.f32 0.012560201, %v2672_v28 }
 0x138   :  { %v410_v51 = vsel %vm378_vm11, %v407_v43, %v409_v47  ;;  %v463_v4 = vsel %vm433_vm12, %v461_v50, %v462_v14  ;;  %v356_v63 = vrot.slane %v2664_v20, 1  ;;  %v453_v52 = vmul.f32 0.34263152, %v2672_v28 }
 0x139   :  { %v420_v60 = vadd.f32 %v410_v51, %v365_v13  ;;  %v474_v44 = vadd.f32 %v463_v4, %v419_v21  ;;  %v498_v55 = vsel %vm478_vm0, %v496_v17, %v497_v16  ;;  %v579_v2 = vrot.slane %v310_v42, 6 }
 0x13a   :  { %v357_v25 = vsel %vm323_vm10, %v354_v39, %v356_v63  ;;  %v464_v46 = vrot.slane %v453_v52, 3  ;;  %v499_v56 = vrot.slane %v2720_v33, 4  ;;  %v304_v23 = vmul.f32 %v2681_v37, %v2681_v37 }
 0x13b   :  { %v509_v26 = vadd.f32 %v498_v55, %v474_v44  ;;  %v533_v29 = vsel %vm513_vm13, %v531_v1, %v532_v45  ;;  %v534_v28 = vrot.slane %v2717_v27, 5  ;;  %v581_v30 = vrot.slane %v311_v22, 6 }
 0x13c   :  { %v465_v31 = vsel %vm433_vm12, %v462_v14, %v464_v46  ;;  %v2761_v32 = vmul.f32 0.07882796, %v304_v23  ;;  %v2764_v34 = vmul.f32 0.23729607, %v2646_v5  ;;  %v454_v33 = vmul.f32 0.34263152, %v2646_v5 }
 0x13d   :  { %v544_v35 = vadd.f32 %v533_v29, %v509_v26  ;;  %v580_v36 = vsel %vm554_vm14, %v578_v62, %v579_v2  ;;  %v366_v38 = vadd.f32 %v357_v25, %v311_v22  ;;  %v475_v39 = vadd.f32 %v465_v31, %v420_v60 }
 0x13e   :  { %v500_v48 = vsel %vm478_vm0, %v497_v16, %v499_v56  ;;  %v2770_v1 = vmul.f32 0.012560201, %v2646_v5  ;;  %v358_v27 = vrot.slane %v2761_v32, 1  ;;  %v411_v40 = vrot.slane %v2764_v34, 2 }
 0x13f   :  { %v340_v42 = vadd.f32 %v332_v18, %v2641_v3  ;;  %v591_v43 = vadd.f32 %v580_v36, %v544_v35  ;;  %v510_v49 = vadd.f32 %v500_v48, %v475_v39  ;;  %v535_v53 = vsel %vm513_vm13, %v532_v45, %v534_v28 }
 0x140   :  { %v582_v11 = vsel %vm554_vm14, %v579_v2, %v581_v30  ;;  %v412_v14 = vsel %vm378_vm11, %v409_v47, %v411_v40  ;;  %v466_v54 = vrot.slane %v454_v33, 3  ;;  %v501_v15 = vrot.slane %v2764_v34, 4 }
 0x141   :  { %1974 = vmatprep.mubr.msk.f32.mxu1 %vm605_vm15, %v591_v43  ;;  %v545_v5 = vadd.f32 %v535_v53, %v510_v49  ;;  %v359_v13 = vsel %vm323_vm10, %v356_v63, %v358_v27  ;;  %v421_v16 = vadd.f32 %v412_v14, %v366_v38  ;;  %v372_v24 = vmul.f32 0.23729607, %v2681_v37 }
 0x142   :  { %v467_v50 = vsel %vm433_vm12, %v464_v46, %v466_v54  ;;  %v536_v17 = vrot.slane %v2664_v20, 5  ;;  %v583_v62 = vrot.slane %v2770_v1, 6  ;;  %v427_v18 = vmul.f32 0.34263152, %v2681_v37 }
 0x143   :  { %v592_v47 = vadd.f32 %v582_v11, %v545_v5  ;;  %v476_v21 = vadd.f32 %v467_v50, %v421_v16  ;;  %v502_v45 = vsel %vm478_vm0, %v499_v56, %v501_v15  ;;  %v386_v22 = vrot.slane %v372_v24, 2 }
 0x144   :  { %v367_v51 = vadd.f32 %v359_v13, %v2770_v1  ;;  %v441_v4 = vrot.slane %v427_v18, 3  ;;  %v548_v63 = vmul.f32 0.012560201, %v2681_v37  ;;  %v400_v52 = vmul.f32 0.23729607, %v304_v23 }
 0x145   :  { %1975 = vmatmul.mubr.msk.f32.vlgmr.msra.gmra.mrb[0].mxu1 %vm605_vm15, %v592_v47  ;;  %v511_v60 = vadd.f32 %v502_v45, %v476_v21  ;;  %v387_v20 = vsel %vm378_vm11, %v384_v8, %v386_v22  ;;  %v486_v44 = vrot.slane %v372_v24, 4  ;;  %v455_v55 = vmul.f32 0.34263152, %v304_v23 }
 0x146   :  { %v537_v2 = vsel %vm513_vm13, %v534_v28, %v536_v17  ;;  %v584_v25 = vsel %vm554_vm14, %v581_v30, %v583_v62  ;;  %v395_v46 = vadd.f32 %v387_v20, %v340_v42  ;;  %v413_v56 = vrot.slane %v400_v52, 2 }
 0x147   :  { %v546_v26 = vadd.f32 %v537_v2, %v511_v60  ;;  %v442_v29 = vsel %vm433_vm12, %v439_v9, %v441_v4  ;;  %v521_v31 = vrot.slane %v2686_v12, 5  ;;  %v468_v34 = vrot.slane %v455_v55, 3 }
 0x148   :  { %v450_v33 = vadd.f32 %v442_v29, %v395_v46  ;;  %v414_v35 = vsel %vm378_vm11, %v411_v40, %v413_v56  ;;  %v503_v8 = vrot.slane %v400_v52, 4  ;;  %v572_v36 = vmul.f32 0.012560201, %v304_v23 }
 0x149   :  { %v593_v38 = vadd.f32 %v584_v25, %v546_v26  ;;  %v487_v28 = vsel %vm478_vm0, %v484_v10, %v486_v44  ;;  %v562_v30 = vrot.slane %v548_v63, 6  ;;  %v422_v39 = vadd.f32 %v414_v35, %v367_v51 }
 0x14a   :  { %v495_v48 = vadd.f32 %v487_v28, %v450_v33  ;;  %v469_v61 = vsel %vm433_vm12, %v466_v54, %v468_v34  ;;  %v538_v9 = vrot.slane %v2761_v32, 5  ;;  %v522_v12 = vsel %vm513_vm13, %v519_v0, %v521_v31 }
 0x14b   :  { %1977 = vmatprep.mubr.msk.f32.mxu1 %vm605_vm15, %v593_v38  ;;  %v477_v1 = vadd.f32 %v469_v61, %v422_v39  ;;  %v504_v27 = vsel %vm478_vm0, %v501_v15, %v503_v8  ;;  %v585_v59 = vrot.slane %v572_v36, 6  ;;  %v563_v10 = vsel %vm554_vm14, %v560_v19, %v562_v30 }
 0x14c   :  { %v530_v23 = vadd.f32 %v522_v12, %v495_v48  ;;  %v539_v43 = vsel %vm513_vm13, %v536_v17, %v538_v9  ;;  %vm968_vm10 = vcmask 261120  }
 0x14d   :  { %v512_v40 = vadd.f32 %v504_v27, %v477_v1  ;;  %v586_v58 = vsel %vm554_vm14, %v583_v62, %v585_v59  ;;  %vm1042_vm14 = vcmask 572416  }
 0x14e   :  { %v571_v42 = vadd.f32 %v563_v10, %v530_v23 }
 0x14f   :  { %v547_v32 = vadd.f32 %v539_v43, %v512_v40 }
 0x150   :  { %1952 = vmatmul.mubr.msk.f32.gmra.mrb[2].mxu0 %vm605_vm15, %v571_v42 }
 0x151   :  { %v594_v49 = vadd.f32 %v586_v58, %v547_v32 }
 0x153   :  { %1978 = vmatmul.mubr.msk.f32.gmra.mrb[2].mxu1 %vm605_vm15, %v594_v49  ;;  %vm1119_vm15 = vcmask 31744  }
 0x209   :  { %v1950_v0 = vpop.f32.mrb[0].mxu0 }
 0x20a   :  { %v848_v53 = vrot.slane %v1950_v0, 5  ;;  %v687_v11 = vpop.f32.mrb[1].mxu0  ;;  %v804_v19 = vmul.f32 %v1950_v0, %v1950_v0 }
 0x20b   :  { %v847_v14 = vrot.slane %v687_v11, 5  ;;  %v803_v54 = vmul.f32 %v687_v11, %v687_v11 }
 0x20d   :  { %854 = vrot.lane.b32.xlu1 %v847_v14, %s2428_s4  ;;  %v849_v3 = vsel %vm513_vm13, %v847_v14, %v848_v53 }
 0x20e   :  { %856 = vrot.lane.b32.xlu0 %v849_v3, %s2428_s4 }
 0x218   :  { %v1976_v15 = vpop.f32.mrb[0].mxu1 }
 0x219   :  { %v808_v5 = vsub.f32 %v1976_v15, %v804_v19  ;;  %v784_v13 = vpop.f32.mrb[1].mxu1 }
 0x21a   :  { %v807_v16 = vsub.f32 %v784_v13, %v803_v54 }
 0x21b   :  { %v812_v24 = vmax.f32 %v808_v5, 0.0 }
 0x21c   :  { %v811_v50 = vmax.f32 %v807_v16, 0.0 }
 0x21d   :  { %2275 = vrsqrt.f32 %v812_v24  ;;  %vm824_vm1 = vcmp.eq.f32.partialorder %v812_v24, inf  ;;  %vm826_vm2 = vcmp.eq.f32.partialorder %v812_v24, 0.0  ;;  %v827_v46 = vand.u32 2147483648, %v812_v24 }
 0x21e   :  { %2277 = vrsqrt.f32 %v811_v50  ;;  %vm817_vm3 = vcmp.eq.f32.partialorder %v811_v50, inf  ;;  %v820_v26 = vand.u32 2147483648, %v811_v50  ;;  %vm819_vm4 = vcmp.eq.f32.partialorder %v811_v50, 0.0 }
 0x223   :  { %v1953_v17 = vpop.f32.mrb[2].mxu0 }
 0x224   :  { %v806_v62 = vmul.f32 %v1953_v17, %v1953_v17  ;;  %v852_v18 = vrot.slane %v1953_v17, 5  ;;  %v697_v47 = vpop.f32.mrb[3].mxu0 }
 0x225   :  { %v805_v21 = vmul.f32 %v697_v47, %v697_v47  ;;  %v850_v45 = vrot.slane %v697_v47, 5 }
 0x226   :  { %v1979_v22 = vpop.f32.mrb[2].mxu1  ;;  %862 = vrot.lane.b32.xlu0 %v852_v18, %s2428_s4 }
 0x227   :  { %v2276_v51 = vpop.eup %2275  ;;  %v810_v4 = vsub.f32 %v1979_v22, %v806_v62  ;;  %v794_v63 = vpop.f32.mrb[3].mxu1  ;;  %v851_v52 = vsel %vm513_vm13, %v848_v53, %v850_v45  ;;  %v853_v60 = vsel %vm513_vm13, %v850_v45, %v852_v18 }
 0x228   :  { %v2278_v20 = vpop.eup %2277  ;;  %v809_v44 = vsub.f32 %v794_v63, %v805_v21  ;;  %858 = vrot.lane.b32.xlu1 %v851_v52, %s2428_s4  ;;  %v823_v55 = vmul.f32 %v2276_v51, %v812_v24 }
 0x229   :  { %v814_v2 = vmax.f32 %v810_v4, 0.0  ;;  %v816_v25 = vmul.f32 %v2278_v20, %v811_v50 }
 0x22a   :  { %v813_v56 = vmax.f32 %v809_v44, 0.0  ;;  %v825_v29 = vsel %vm824_vm1, %v812_v24, %v823_v55  ;;  %v2431_v44 = vmov 0.0|0.0   ;;  %vm1220_vm1 = vcmask 64512  }
 0x22b   :  { %2279 = vrsqrt.f32 %v814_v2  ;;  %v818_v31 = vsel %vm817_vm3, %v811_v50, %v816_v25  ;;  %v828_v34 = vsel %vm826_vm2, %v827_v46, %v825_v29  ;;  %vm838_vm5 = vcmp.eq.f32.partialorder %v814_v2, inf  ;;  %2128 = vmatprep.subr.bf16.mxu0 %v2431_v44  ;;  %2134 = vmatprep.subr.bf16.mxu1 %v2431_v44 }
 0x22c   :  { %2281 = vrsqrt.f32 %v813_v56  ;;  %860 = vrot.lane.b32.xlu1 %v853_v60, %s2428_s4  ;;  %v821_v33 = vsel %vm819_vm4, %v820_v26, %v818_v31  ;;  %v875_v35 = vadd.f32 0.003921569, %v828_v34  ;;  %v841_v39 = vand.u32 2147483648, %v814_v2 }
 0x22d   :  { %v874_v8 = vadd.f32 0.003921569, %v821_v33  ;;  %vm831_vm6 = vcmp.eq.f32.partialorder %v813_v56, inf  ;;  %v834_v61 = vand.u32 2147483648, %v813_v56  ;;  %vm840_vm7 = vcmp.eq.f32.partialorder %v814_v2, 0.0 }
 0x22e   :  { %2283 = vrcp.f32 %v875_v35  ;;  %vm833_vm8 = vcmp.eq.f32.partialorder %v813_v56, 0.0  ;;  %v2433_v33 = vmov 0.0   ;;  %vm1772_vm3 = vcmask 27648  }
 0x22f   :  { %2285 = vrcp.f32 %v874_v8  ;;  %1988 = vmatprep.mubr.msk.f32.mxu0 %vm2432_vm9, %v2433_v33  ;;  %2009 = vmatprep.mubr.msk.f32.mxu1 %vm2432_vm9, %v2433_v33 }
 0x235   :  { %v2280_v36 = vpop.eup %2279 }
 0x236   :  { %v2282_v38 = vpop.eup %2281  ;;  %v837_v28 = vmul.f32 %v2280_v36, %v814_v2 }
 0x237   :  { %v830_v30 = vmul.f32 %v2282_v38, %v813_v56  ;;  %v926_v38 = vld [vmem:[#allocation8] sm:$0xff] }
 0x238   :  { %v2284_v48 = vpop.eup %2283  ;;  %v839_v9 = vsel %vm838_vm5, %v814_v2, %v837_v28  ;;  %v927_v28 = vld [vmem:[#allocation8 + $0x8] sm:$0xff]  ;;  %vm1785_vm5 = vcmask 0  }
 0x239   :  { %v2286_v12 = vpop.eup %2285  ;;  %v883_v1 = vmul.f32 %v2284_v48, %v875_v35  ;;  %v832_v23 = vsel %vm831_vm6, %v813_v56, %v830_v30  ;;  %v842_v27 = vsel %vm840_vm7, %v841_v39, %v839_v9  ;;  %v928_v30 = vld [vmem:[#allocation8 + $0x10] sm:$0xff]  ;;  %v2855_v39 = vpack.c.bf16 %v927_v28, %v926_v38 }
 0x23a   :  { %v882_v59 = vmul.f32 %v2286_v12, %v874_v8  ;;  %v835_v10 = vsel %vm833_vm8, %v834_v61, %v832_v23  ;;  %v877_v40 = vadd.f32 0.003921569, %v842_v27  ;;  %v930_v23 = vld [vmem:[#allocation8 + $0x20] sm:$0xff]  ;;  %v931_v27 = vld [vmem:[#allocation8 + $0x28] sm:$0xff] }
 0x23b   :  { %v887_v42 = vsub.f32 2.0, %v883_v1  ;;  %v876_v43 = vadd.f32 0.003921569, %v835_v10  ;;  %2136 = vmatpush3.bf16.msra.mxu1 %v2855_v39  ;;  %v932_v10 = vld [vmem:[#allocation8 + $0x30] sm:$0xff] }
 0x23c   :  { %v886_v32 = vsub.f32 2.0, %v882_v59  ;;  %2287 = vrcp.f32 %v877_v40  ;;  %2137 = vmatprep.subr.bf16.mxu1 %v2431_v44  ;;  %v2141_v59 = vpack.c.bf16 %v931_v27, %v930_v23 }
 0x23d   :  { %v891_v58 = vmul.f32 %v2284_v48, %v887_v42  ;;  %2289 = vrcp.f32 %v876_v43  ;;  %v929_v48 = vld [vmem:[#allocation8 + $0x18] sm:$0xff] }
 0x23e   :  { %v890_v49 = vmul.f32 %v2286_v12, %v886_v32  ;;  %v2861_v12 = vpack.c.bf16 %v929_v48, %v928_v30 }
 0x23f   :  { %v899_v0 = vrot.slane %v891_v58, 5 }
 0x240   :  { %v898_v53 = vrot.slane %v890_v49, 5  ;;  %2139 = vmatpush3.bf16.msra.mxu1 %v2861_v12 }
 0x241   :  { %2140 = vmatprep.subr.bf16.mxu1 %v2431_v44 }
 0x242   :  { %905 = vrot.lane.b32.xlu0 %v898_v53, %s2428_s4  ;;  %v900_v11 = vsel %vm513_vm13, %v898_v53, %v899_v0 }
 0x243   :  { %907 = vrot.lane.b32.xlu1 %v900_v11, %s2428_s4 }
 0x244   :  { %2142 = vmatpush3.bf16.msra.mxu1 %v2141_v59 }
 0x245   :  { %2143 = vmatprep.subr.bf16.mxu1 %v2431_v44 }
 0x246   :  { %v2288_v14 = vpop.eup %2287 }
 0x247   :  { %v2290_v3 = vpop.eup %2289  ;;  %v885_v19 = vmul.f32 %v2288_v14, %v877_v40  ;;  %v933_v40 = vld [vmem:[#allocation8 + $0x38] sm:$0xff] }
 0x248   :  { %v884_v54 = vmul.f32 %v2290_v3, %v876_v43  ;;  %v2144_v42 = vpack.c.bf16 %v933_v40, %v932_v10 }
 0x249   :  { %v889_v15 = vsub.f32 2.0, %v885_v19  ;;  %v934_v19 = vld [vmem:[#allocation8 + $0x40] sm:$0x3f] }
 0x24a   :  { %v888_v5 = vsub.f32 2.0, %v884_v54  ;;  %2145 = vmatpush3.bf16.msra.mxu1 %v2144_v42 }
 0x24b   :  { %v893_v13 = vmul.f32 %v2288_v14, %v889_v15  ;;  %2007 = vmatprep.subr.mxu1 %v2433_v33 }
 0x24c   :  { %v892_v16 = vmul.f32 %v2290_v3, %v888_v5  ;;  %v925_v3 = vld [vmem:[#allocation7] sm:$0xf]  ;;  %v935_v5 = vld [vmem:[#allocation10] sm:$0xff] }
 0x24d   :  { %v903_v24 = vrot.slane %v893_v13, 5 }
 0x24e   :  { %v901_v50 = vrot.slane %v892_v16, 5  ;;  %2008 = vmatpush3.msk.msra.mxu1 %vm378_vm11, %v934_v19  ;;  %v936_v16 = vld [vmem:[#allocation10 + $0x8] sm:$0xff] }
 0x250   :  { %v904_v17 = vsel %vm513_vm13, %v901_v50, %v903_v24  ;;  %v902_v62 = vsel %vm513_vm13, %v899_v0, %v901_v50 }
 0x251   :  { %911 = vrot.lane.b32.xlu1 %v904_v17, %s2428_s4  ;;  %909 = vrot.lane.b32.xlu0 %v902_v62, %s2428_s4  ;;  %v937_v17 = vld [vmem:[#allocation10 + $0x10] sm:$0xff]  ;;  %v938_v62 = vld [vmem:[#allocation10 + $0x18] sm:$0xff] }
 0x255   :  { %913 = vrot.lane.b32.xlu0 %v903_v24, %s2428_s4  ;;  %v939_v24 = vld [vmem:[%s2953_s5] sm:$0xff] }
 0x27f   :  { %v855_v18 = vpop.permute.xlu1 %854 }
 0x280   :  { %v857_v47 = vpop.permute.xlu0 %856  ;;  %v869_v63 = vsub.f32 %v2590_v41, %v855_v18 }
 0x281   :  { %v870_v52 = vsub.f32 %v2648_v6, %v857_v47 }
 0x298   :  { %v863_v45 = vpop.permute.xlu0 %862 }
 0x299   :  { %v873_v29 = vsub.f32 %v2681_v37, %v863_v45 }
 0x29a   :  { %v859_v21 = vpop.permute.xlu1 %858 }
 0x29b   :  { %v871_v55 = vsub.f32 %v2650_v7, %v859_v21 }
 0x29e   :  { %v861_v22 = vpop.permute.xlu1 %860 }
 0x29f   :  { %v872_v2 = vsub.f32 %v2621_v57, %v861_v22 }
 0x2b4   :  { %v906_v51 = vpop.permute.xlu0 %905 }
 0x2b5   :  { %v908_v4 = vpop.permute.xlu1 %907  ;;  %v2835_v60 = vmul.f32 %v906_v51, %v869_v63 }
 0x2b6   :  { %v2837_v20 = vmul.f32 %v908_v4, %v870_v52 }
 0x2b7   :  { %v947_v56 = vrot.slane %v2835_v60, 3 }
 0x2b8   :  { %v948_v26 = vrot.slane %v2837_v20, 3 }
 0x2ba   :  { %v949_v35 = vsel %vm433_vm12, %v947_v56, %v948_v26 }
 0x2c3   :  { %v912_v25 = vpop.permute.xlu1 %911  ;;  %v910_v46 = vpop.permute.xlu0 %909 }
 0x2c4   :  { %v2843_v41 = vmul.f32 %v912_v25, %v872_v2  ;;  %v2845_v6 = vmul.f32 %v910_v46, %v871_v55 }
 0x2c6   :  { %v950_v31 = vrot.slane %v2845_v6, 3  ;;  %v952_v57 = vrot.slane %v2843_v41, 3 }
 0x2c7   :  { %v914_v34 = vpop.permute.xlu0 %913 }
 0x2c8   :  { %v2850_v7 = vmul.f32 %v914_v34, %v873_v29  ;;  %v951_v8 = vsel %vm433_vm12, %v948_v26, %v950_v31  ;;  %v953_v61 = vsel %vm433_vm12, %v950_v31, %v952_v57 }
 0x2c9   :  { %v2225_v36 = vpack.i.bf16 %v951_v8, %v949_v35 }
 0x2ca   :  { %v954_v37 = vrot.slane %v2850_v7, 3 }
 0x2cb   :  { %2226 = vrot.lane.b32.xlu1 %v2225_v36, %s2434_s14 }
 0x2cc   :  { %v955_v9 = vsel %vm433_vm12, %v952_v57, %v954_v37 }
 0x2cd   :  { %v2230_v1 = vpack.i.bf16 %v955_v9, %v953_v61 }
 0x2cf   :  { %2231 = vrot.lane.b32.xlu0 %v2230_v1, %s2434_s14 }
 0x33d   :  { %v2227_v43 = vpop.permute.xlu1 %2226 }
 0x33e   :  { %v2229_v32 = vunpack.i.h.bf16 %v2227_v43  ;;  %v2228_v58 = vunpack.i.l.bf16 %v2227_v43 }
 0x340   :  { %v2129_v49 = vpack.c.bf16 %v2229_v32, %v2228_v58 }
 0x341   :  { %v2232_v0 = vpop.permute.xlu0 %2231 }
 0x342   :  { %v2234_v53 = vunpack.i.h.bf16 %v2232_v0  ;;  %v2233_v11 = vunpack.i.l.bf16 %v2232_v0  ;;  %2130 = vmatpush3.bf16.msra.mxu0 %v2129_v49 }
 0x343   :  { %2131 = vmatprep.subr.bf16.mxu0 %v2431_v44 }
 0x344   :  { %v2132_v14 = vpack.c.bf16 %v2234_v53, %v2233_v11 }
 0x346   :  { %2133 = vmatpush3.bf16.msra.mxu0 %v2132_v14 }
 0x349   :  { %1989 = vmatmul.mubr.msk.f32.vlgmr.msra.gmra.mrb[4].mxu0 %vm968_vm10, %v925_v3 }
 0x34a   :  { %2014 = vmatprep.mubr.msk.f32.mxu0 %vm1119_vm15, %v935_v5 }
 0x41c   :  { %v1038_v54 = vpop.f32.mrb[4].mxu0 }
 0x41d   :  { %v1990_v15 = vpop.f32.mrb[5].mxu0  ;;  %2010 = vmatmul.mubr.msk.f32.vlgmr.msra.gmra.mrb[4].mxu1 %vm1042_vm14, %v1038_v54 }
 0x4f0   :  { %v2867_v13 = vpop.f32.mrb[4].mxu1 }
 0x4f1   :  { %v2011_v50 = vpop.f32.mrb[5].mxu1  ;;  %2012 = vmatprep.subr.msk.mxu0 %vm478_vm0, %v2867_v13 }
 0x4f2   :  { %2013 = vmatpush3.msk.msra.mxu0 %vm478_vm0, %v2867_v13 }
 0x4f3   :  { %2015 = vmatmul.mubr.msk.f32.vlgmr.msra.gmra.mrb[6].mxu0 %vm1119_vm15, %v936_v16  ;;  %2020 = vmatprep.subr.mxu0 %v939_v24 }
 0x4f4   :  { %2017 = vmatprep.mubr.msk.f32.mxu0 %vm1119_vm15, %v937_v17  ;;  %2021 = vmatpush3.msra.mxu0 %v939_v24 }
 0x4f5   :  { %2179 = vmatprep.subr.bf16.mxu0 %v2855_v39 }
 0x4f7   :  { %2018 = vmatmul.mubr.msk.f32.gmra.mrb[8].mxu0 %vm1119_vm15, %v938_v62 }
 0x5c6   :  { %v2016_v18 = vpop.f32.mrb[6].mxu0 }
 0x5c7   :  { %v1201_v47 = vpop.f32.mrb[7].mxu0 }
 0x5c8   :  { %2022 = vmatprep.mubr.msk.f32.mxu0 %vm1220_vm1, %v1201_v47 }
 0x5c9   :  { %2023 = vmatmul.mubr.msk.f32.vlgmr.msra.gmra.mrb[10].mxu0 %vm1220_vm1, %v2016_v18 }
 0x5ca   :  { %v2019_v21 = vpop.f32.mrb[8].mxu0  ;;  %2181 = vmatpush3.bf16.msra.mxu0 %v2855_v39 }
 0x5cb   :  { %v1211_v45 = vpop.f32.mrb[9].mxu0  ;;  %2183 = vmatprep.subr.bf16.mxu0 %v2861_v12 }
 0x5cc   :  { %2025 = vmatprep.mubr.msk.f32.mxu0 %vm1220_vm1, %v1211_v45 }
 0x5cd   :  { %2026 = vmatmul.mubr.msk.f32.gmra.mrb[12].mxu0 %vm1220_vm1, %v2019_v21 }
 0x5ce   :  { %2185 = vmatpush3.bf16.msra.mxu0 %v2861_v12 }
 0x5cf   :  { %2187 = vmatprep.subr.bf16.mxu0 %v2141_v59 }
 0x5d2   :  { %2189 = vmatpush3.bf16.msra.mxu0 %v2141_v59 }
 0x5d3   :  { %2191 = vmatprep.subr.bf16.mxu0 %v2144_v42 }
 0x5d6   :  { %2193 = vmatpush3.bf16.msra.mxu0 %v2144_v42 }
 0x5d7   :  { %2079 = vmatprep.subr.msk.mxu0 %vm378_vm11, %v934_v19 }
 0x5da   :  { %2080 = vmatpush3.msk.msra.mxu0 %vm378_vm11, %v934_v19 }
 0x69c   :  { %v2024_v22 = vpop.f32.mrb[10].mxu0 }
 0x69d   :  { %v1323_v51 = vrot.slane %v2024_v22, 5  ;;  %v1299_v4 = vpop.f32.mrb[11].mxu0 }
 0x69e   :  { %v1322_v63 = vrot.slane %v1299_v4, 5 }
 0x6a0   :  { %1329 = vrot.lane.b32.xlu1 %v1322_v63, %s2428_s4  ;;  %v2027_v52 = vpop.f32.mrb[12].mxu0  ;;  %v1324_v44 = vsel %vm513_vm13, %v1322_v63, %v1323_v51 }
 0x6a1   :  { %v1327_v55 = vrot.slane %v2027_v52, 5  ;;  %1331 = vrot.lane.b32.xlu0 %v1324_v44, %s2428_s4  ;;  %v1309_v2 = vpop.f32.mrb[13].mxu0 }
 0x6a2   :  { %v1325_v25 = vrot.slane %v1309_v2, 5 }
 0x6a4   :  { %v1328_v46 = vsel %vm513_vm13, %v1325_v25, %v1327_v55  ;;  %v1326_v56 = vsel %vm513_vm13, %v1323_v51, %v1325_v25 }
 0x6a5   :  { %1335 = vrot.lane.b32.xlu0 %v1328_v46, %s2428_s4  ;;  %1333 = vrot.lane.b32.xlu1 %v1326_v56, %s2428_s4 }
 0x6a9   :  { %1337 = vrot.lane.b32.xlu1 %v1327_v55, %s2428_s4 }
 0x712   :  { %v1330_v26 = vpop.permute.xlu1 %1329 }
 0x713   :  { %v1344_v29 = vsub.f32 %v2835_v60, %v1330_v26  ;;  %v1332_v31 = vpop.permute.xlu0 %1331 }
 0x714   :  { %v1345_v34 = vsub.f32 %v2837_v20, %v1332_v31 }
 0x715   :  { %v1349_v33 = vmul.f32 %v1344_v29, %v1344_v29  ;;  %v1354_v9 = vand.u32 2147483647, %v1344_v29 }
 0x716   :  { %v1350_v57 = vmul.f32 %v1345_v34, %v1345_v34  ;;  %v1355_v49 = vand.u32 2147483647, %v1345_v34 }
 0x717   :  { %v1336_v35 = vpop.permute.xlu0 %1335  ;;  %v1334_v8 = vpop.permute.xlu1 %1333  ;;  %v1359_v28 = vmul.f32 %v1349_v33, %v1344_v29  ;;  %v1374_v37 = vrot.slane %v1349_v33, 3  ;;  %v1364_v20 = vmul.f32 %v1349_v33, %v1349_v33  ;;  %v1416_v63 = vrot.slane %v1354_v9, 3 }
 0x718   :  { %v2893_v36 = vsub.f32 %v2843_v41, %v1336_v35  ;;  %v1346_v38 = vsub.f32 %v2845_v6, %v1334_v8  ;;  %v1360_v30 = vmul.f32 %v1350_v57, %v1345_v34  ;;  %v1375_v39 = vrot.slane %v1350_v57, 3 }
 0x719   :  { %v1365_v1 = vmul.f32 %v1350_v57, %v1350_v57  ;;  %v1388_v59 = vrot.slane %v1359_v28, 3  ;;  %v1402_v5 = vrot.slane %v1364_v20, 3  ;;  %v1417_v52 = vrot.slane %v1355_v49, 3 }
 0x71a   :  { %v1352_v48 = vmul.f32 %v2893_v36, %v2893_v36  ;;  %v1351_v60 = vmul.f32 %v1346_v38, %v1346_v38  ;;  %v1389_v10 = vrot.slane %v1360_v30, 3  ;;  %v1376_v40 = vsel %vm433_vm12, %v1374_v37, %v1375_v39  ;;  %v940_v30 = vld [vmem:[%s2954_s6] sm:$0xff] }
 0x71b   :  { %v1338_v61 = vpop.permute.xlu1 %1337  ;;  %v1356_v0 = vand.u32 2147483647, %v1346_v38  ;;  %v1403_v16 = vrot.slane %v1365_v1, 3  ;;  %v1357_v44 = vand.u32 2147483647, %v2893_v36  ;;  %v1418_v33 = vsel %vm433_vm12, %v1416_v63, %v1417_v52  ;;  %2060 = vmatprep.mubr.f32.mxu1 %v940_v30 }
 0x71c   :  { %v1348_v12 = vsub.f32 %v2850_v7, %v1338_v61  ;;  %v1361_v23 = vmul.f32 %v1351_v60, %v1346_v38  ;;  %v1366_v27 = vmul.f32 %v1351_v60, %v1351_v60  ;;  %v1377_v41 = vrot.slane %v1351_v60, 3 }
 0x71d   :  { %v1362_v42 = vmul.f32 %v1352_v48, %v2893_v36  ;;  %v1379_v58 = vrot.slane %v1352_v48, 3  ;;  %v1367_v54 = vmul.f32 %v1352_v48, %v1352_v48  ;;  %v1390_v50 = vsel %vm433_vm12, %v1388_v59, %v1389_v10 }
 0x71e   :  { %v1353_v6 = vmul.f32 %v1348_v12, %v1348_v12  ;;  %v1391_v43 = vrot.slane %v1361_v23, 3  ;;  %v1378_v32 = vsel %vm433_vm12, %v1375_v39, %v1377_v41  ;;  %v1405_v19 = vrot.slane %v1366_v27, 3 }
 0x71f   :  { %v2235_v11 = vpack.i.bf16 %v1378_v32, %v1376_v40  ;;  %v1393_v24 = vrot.slane %v1362_v42, 3  ;;  %v1380_v17 = vsel %vm433_vm12, %v1377_v41, %v1379_v58  ;;  %v1419_v18 = vrot.slane %v1356_v0, 3 }
 0x720   :  { %v1363_v53 = vmul.f32 %v1353_v6, %v1348_v12  ;;  %v1368_v7 = vmul.f32 %v1353_v6, %v1353_v6  ;;  %v1392_v14 = vsel %vm433_vm12, %v1389_v10, %v1391_v43  ;;  %v1381_v3 = vrot.slane %v1353_v6, 3 }
 0x721   :  { %2236 = vrot.lane.b32.xlu0 %v2235_v11, %s2434_s14  ;;  %v2245_v47 = vpack.i.bf16 %v1392_v14, %v1390_v50  ;;  %v1358_v45 = vand.u32 2147483647, %v1348_v12  ;;  %v1406_v22 = vsel %vm433_vm12, %v1403_v16, %v1405_v19  ;;  %v1404_v55 = vsel %vm433_vm12, %v1402_v5, %v1403_v16 }
 0x722   :  { %v1395_v15 = vrot.slane %v1363_v53, 3  ;;  %v1382_v62 = vsel %vm433_vm12, %v1379_v58, %v1381_v3  ;;  %v1409_v4 = vrot.slane %v1368_v7, 3  ;;  %v1394_v2 = vsel %vm433_vm12, %v1391_v43, %v1393_v24 }
 0x723   :  { %v2240_v21 = vpack.i.bf16 %v1382_v62, %v1380_v17  ;;  %v1407_v25 = vrot.slane %v1367_v54, 3  ;;  %v2255_v46 = vpack.i.bf16 %v1406_v22, %v1404_v55  ;;  %v1423_v26 = vrot.slane %v1358_v45, 3 }
 0x724   :  { %v1396_v51 = vsel %vm433_vm12, %v1393_v24, %v1395_v15  ;;  %v1420_v29 = vsel %vm433_vm12, %v1417_v52, %v1419_v18  ;;  %v1421_v34 = vrot.slane %v1357_v44, 3  ;;  %v941_v24 = vld [vmem:[%s2954_s6 + $0x8] sm:$0xff]  ;;  %s2435_s6 = smov 124  }
 0x725   :  { %2246 = vrot.lane.b32.xlu0 %v2245_v47, %s2434_s14  ;;  %2241 = vrot.lane.b32.xlu1 %v2240_v21, %s2434_s14  ;;  %v2250_v56 = vpack.i.bf16 %v1396_v51, %v1394_v2  ;;  %v1410_v31 = vsel %vm433_vm12, %v1407_v25, %v1409_v4  ;;  %v1408_v57 = vsel %vm433_vm12, %v1405_v19, %v1407_v25  ;;  %v1839_v21 = vadd.f32 -0.17640524, %v2867_v13 }
 0x726   :  { %v2265_v35 = vpack.i.bf16 %v1420_v29, %v1418_v33  ;;  %v2260_v8 = vpack.i.bf16 %v1410_v31, %v1408_v57  ;;  %v1424_v36 = vsel %vm433_vm12, %v1421_v34, %v1423_v26  ;;  %v1422_v38 = vsel %vm433_vm12, %v1419_v18, %v1421_v34 }
 0x727   :  { %v2270_v28 = vpack.i.bf16 %v1424_v36, %v1422_v38  ;;  %v1665_v26 = vmul.f32 %v1839_v21, %v1839_v21 }
 0x729   :  { %2256 = vrot.lane.b32.xlu0 %v2255_v46, %s2434_s14  ;;  %2251 = vrot.lane.b32.xlu1 %v2250_v56, %s2434_s14 }
 0x72d   :  { %2266 = vrot.lane.b32.xlu0 %v2265_v35, %s2434_s14  ;;  %2261 = vrot.lane.b32.xlu1 %v2260_v8, %s2434_s14 }
 0x731   :  { %2271 = vrot.lane.b32.xlu1 %v2270_v28, %s2434_s14 }
 0x793   :  { %v2237_v37 = vpop.permute.xlu0 %2236 }
 0x794   :  { %v2239_v39 = vunpack.i.h.bf16 %v2237_v37  ;;  %v2238_v48 = vunpack.i.l.bf16 %v2237_v37  ;;  %v1666_v37 = vmul.f32 0.7536576, %v1665_v26 }
 0x796   :  { %v2146_v60 = vpack.c.bf16 %v2239_v39, %v2238_v48 }
 0x797   :  { %v2247_v61 = vpop.permute.xlu0 %2246  ;;  %v2242_v9 = vpop.permute.xlu1 %2241 }
 0x798   :  { %v2249_v20 = vunpack.i.h.bf16 %v2247_v61  ;;  %v2248_v12 = vunpack.i.l.bf16 %v2247_v61  ;;  %v2244_v1 = vunpack.i.h.bf16 %v2242_v9  ;;  %v2243_v23 = vunpack.i.l.bf16 %v2242_v9  ;;  %2147 = vmatprep.subr.bf16.mxu1 %v2146_v60 }
 0x799   :  { %2149 = vmatpush3.bf16.msra.mxu1 %v2146_v60 }
 0x79a   :  { %v2150_v27 = vpack.c.bf16 %v2244_v1, %v2243_v23  ;;  %v2154_v59 = vpack.c.bf16 %v2249_v20, %v2248_v12 }
 0x79b   :  { %v2252_v41 = vpop.permute.xlu1 %2251  ;;  %v2257_v40 = vpop.permute.xlu0 %2256 }
 0x79c   :  { %v2254_v10 = vunpack.i.h.bf16 %v2252_v41  ;;  %v2253_v6 = vunpack.i.l.bf16 %v2252_v41  ;;  %2151 = vmatprep.subr.bf16.mxu1 %v2150_v27  ;;  %v2259_v42 = vunpack.i.h.bf16 %v2257_v40  ;;  %v2258_v43 = vunpack.i.l.bf16 %v2257_v40 }
 0x79d   :  { %2153 = vmatpush3.bf16.msra.mxu1 %v2150_v27 }
 0x79e   :  { %2155 = vmatprep.subr.bf16.mxu1 %v2154_v59  ;;  %v2158_v32 = vpack.c.bf16 %v2254_v10, %v2253_v6  ;;  %v2162_v49 = vpack.c.bf16 %v2259_v42, %v2258_v43 }
 0x79f   :  { %v2262_v58 = vpop.permute.xlu1 %2261  ;;  %v2267_v11 = vpop.permute.xlu0 %2266 }
 0x7a0   :  { %v2264_v0 = vunpack.i.h.bf16 %v2262_v58  ;;  %v2263_v53 = vunpack.i.l.bf16 %v2262_v58  ;;  %v2269_v7 = vunpack.i.h.bf16 %v2267_v11  ;;  %v2268_v14 = vunpack.i.l.bf16 %v2267_v11 }
 0x7a1   :  { %2157 = vmatpush3.bf16.msra.mxu1 %v2154_v59 }
 0x7a2   :  { %2159 = vmatprep.subr.bf16.mxu1 %v2158_v32  ;;  %v2166_v3 = vpack.c.bf16 %v2264_v0, %v2263_v53  ;;  %v2170_v54 = vpack.c.bf16 %v2269_v7, %v2268_v14 }
 0x7a3   :  { %v2272_v19 = vpop.permute.xlu1 %2271 }
 0x7a4   :  { %v2274_v15 = vunpack.i.h.bf16 %v2272_v19  ;;  %v2273_v5 = vunpack.i.l.bf16 %v2272_v19 }
 0x7a5   :  { %2161 = vmatpush3.bf16.msra.mxu1 %v2158_v32 }
 0x7a6   :  { %2163 = vmatprep.subr.bf16.mxu1 %v2162_v49  ;;  %v2174_v16 = vpack.c.bf16 %v2274_v15, %v2273_v5 }
 0x7a9   :  { %2165 = vmatpush3.bf16.msra.mxu1 %v2162_v49 }
 0x7aa   :  { %2167 = vmatprep.subr.bf16.mxu1 %v2166_v3 }
 0x7ad   :  { %2169 = vmatpush3.bf16.msra.mxu1 %v2166_v3 }
 0x7ae   :  { %2171 = vmatprep.subr.bf16.mxu1 %v2170_v54 }
 0x7b1   :  { %2173 = vmatpush3.bf16.msra.mxu1 %v2170_v54 }
 0x7b2   :  { %2175 = vmatprep.subr.bf16.mxu1 %v2174_v16 }
 0x7b5   :  { %2177 = vmatpush3.bf16.msra.mxu1 %v2174_v16 }
 0x7b8   :  { %2061 = vmatmul.mubr.f32.vlgmr.msra.gmra.mrb[6].mxu1 %v941_v24 }
 0x88b   :  { %v2062_v50 = vpop.f32.mrb[6].mxu1 }
 0x88c   :  { %v1539_v17 = vpop.f32.mrb[7].mxu1 }
 0x88d   :  { %2081 = vmatprep.mubr.msk.f32.mxu0 %vm1042_vm14, %v1539_v17 }
 0x88e   :  { %2082 = vmatmul.mubr.msk.f32.vlgmr.msra.gmra.mrb[14].mxu0 %vm1042_vm14, %v2062_v50 }
 0x961   :  { %v2083_v62 = vpop.f32.mrb[14].mxu0 }
 0x962   :  { %v2933_v18 = vadd.f32 -0.0978738, %v2083_v62  ;;  %v1620_v47 = vpop.f32.mrb[15].mxu0  ;;  %v1653_v34 = vmul.f32 %v2083_v62, %v2083_v62 }
 0x963   :  { %2291 = vrsqrt.f32 %v1620_v47  ;;  %v1636_v22 = vadd.f32 1e-06, %v1620_v47  ;;  %vm1631_vm0 = vcmp.eq.f32.partialorder %v1620_v47, inf  ;;  %v1634_v55 = vand.u32 2147483648, %v1620_v47 }
 0x964   :  { %v1672_v45 = vrot.slane %v2933_v18, 4  ;;  %vm1633_vm11 = vcmp.eq.f32.partialorder %v1620_v47, 0.0  ;;  %v1707_v17 = vmul.f32 %v2933_v18, %v2933_v18 }
 0x965   :  { %2293 = vrsqrt.f32 %v1636_v22  ;;  %v1650_v4 = vmul.f32 %v1636_v22, %v1636_v22  ;;  %v1655_v63 = vrot.slane %v1636_v22, 4  ;;  %vm1639_vm12 = vcmp.eq.f32.partialorder %v1636_v22, inf }
 0x966   :  { %v1674_v51 = vmul.f32 %v1839_v21, %v1672_v45  ;;  %v1642_v13 = vand.u32 2147483648, %v1636_v22  ;;  %vm1641_vm13 = vcmp.eq.f32.partialorder %v1636_v22, 0.0 }
 0x967   :  { %2295 = vrcp.f32 %v1650_v4 }
 0x968   :  { %2297 = vrcp.f32 %v1655_v63  ;;  %v1675_v60 = vmul.f32 0.046698324, %v1674_v51  ;;  %v1708_v51 = vmul.f32 0.40576258, %v1707_v17 }
 0x96d   :  { %v2292_v52 = vpop.eup %2291 }
 0x96e   :  { %v1630_v44 = vmul.f32 %v2292_v52, %v1620_v47 }
 0x96f   :  { %v2294_v2 = vpop.eup %2293 }
 0x970   :  { %v1632_v25 = vsel %vm1631_vm0, %v1620_v47, %v1630_v44  ;;  %v1638_v56 = vmul.f32 %v2294_v2, %v1636_v22 }
 0x971   :  { %v1635_v46 = vsel %vm1633_vm11, %v1634_v55, %v1632_v25  ;;  %v2296_v31 = vpop.eup %2295  ;;  %v1710_v55 = vrot.slane %v1708_v51, 4 }
 0x972   :  { %v1840_v29 = vadd.f32 -0.04001572, %v1635_v46  ;;  %v1640_v33 = vsel %vm1639_vm12, %v1636_v22, %v1638_v56  ;;  %v2298_v57 = vpop.eup %2297  ;;  %v1652_v8 = vmul.f32 %v2296_v31, %v2083_v62 }
 0x973   :  { %v1643_v35 = vsel %vm1641_vm13, %v1642_v13, %v1640_v33  ;;  %v1658_v28 = vmul.f32 %v2298_v57, %v1653_v34 }
 0x974   :  { %v1668_v36 = vmul.f32 %v1840_v29, %v1839_v21  ;;  %v1644_v38 = vmul.f32 %v1643_v35, %v1636_v22  ;;  %v1695_v30 = vmul.f32 %v1840_v29, %v1672_v45  ;;  %v1843_v39 = vadd.f32 -0.1867558, %v1652_v8 }
 0x975   :  { %v1844_v9 = vadd.f32 0.09772779, %v1658_v28  ;;  %v1692_v54 = vmul.f32 %v1840_v29, %v1840_v29 }
 0x976   :  { %v1669_v48 = vmul.f32 0.041870497, %v1668_v36  ;;  %v1646_v61 = vrot.slane %v1644_v38, 4  ;;  %v1683_v12 = vmul.f32 %v1843_v39, %v1839_v21  ;;  %v1701_v1 = vmul.f32 %v1843_v39, %v1840_v29 }
 0x977   :  { %v1720_v23 = vrot.slane %v1843_v39, 4  ;;  %v1687_v27 = vrot.slane %v1844_v9, 4  ;;  %v1728_v41 = vmul.f32 %v1844_v9, %v2933_v18  ;;  %v1693_v24 = vmul.f32 0.7236776, %v1692_v54 }
 0x978   :  { %v1670_v20 = vadd.f32 %v1669_v48, %v1666_v37  ;;  %2299 = vrcp.f32 %v1646_v61  ;;  %v1684_v19 = vmul.f32 0.049223922, %v1683_v12  ;;  %v1702_v63 = vmul.f32 0.19194877, %v1701_v1 }
 0x979   :  { %v1722_v10 = vmul.f32 %v2933_v18, %v1720_v23  ;;  %v1689_v6 = vmul.f32 %v1839_v21, %v1687_v27  ;;  %v1704_v40 = vmul.f32 %v1840_v29, %v1687_v27  ;;  %v1755_v42 = vmul.f32 %v1843_v39, %v1687_v27 }
 0x97a   :  { %v1676_v59 = vadd.f32 %v1675_v60, %v1670_v20  ;;  %v1729_v13 = vmul.f32 -0.03436337, %v1728_v41  ;;  %v1758_v37 = vmul.f32 %v1844_v9, %v1844_v9 }
 0x97b   :  { %v1690_v5 = vmul.f32 0.07026428, %v1689_v6  ;;  %v1705_v52 = vmul.f32 -0.029535664, %v1704_v40  ;;  %v1723_v25 = vmul.f32 -0.01864504, %v1722_v10 }
 0x97c   :  { %v1731_v33 = vrot.slane %v1729_v13, 4  ;;  %v1759_v12 = vmul.f32 0.5169746, %v1758_v37 }
 0x97d   :  { %v1725_v31 = vrot.slane %v1723_v25, 4 }
 0x97e   :  { %v1761_v41 = vrot.slane %v1759_v12, 4 }
 0x982   :  { %v2300_v43 = vpop.eup %2299 }
 0x983   :  { %v1649_v32 = vmul.f32 %v2300_v43, %v1620_v47  ;;  %v1696_v47 = vmul.f32 -0.028621854, %v1695_v30  ;;  %v1752_v30 = vmul.f32 %v1843_v39, %v1843_v39 }
 0x985   :  { %v1842_v58 = vadd.f32 -0.22408932, %v1649_v32  ;;  %v1753_v20 = vmul.f32 0.57017225, %v1752_v30 }
 0x987   :  { %v1678_v49 = vrot.slane %v1842_v58, 4  ;;  %v1713_v0 = vmul.f32 %v1842_v58, %v2933_v18  ;;  %v1740_v53 = vmul.f32 %v1842_v58, %v1720_v23  ;;  %v1746_v11 = vmul.f32 %v1844_v9, %v1842_v58 }
 0x988   :  { %v1734_v46 = vmul.f32 %v1842_v58, %v1842_v58  ;;  %v1756_v23 = vmul.f32 -0.160223, %v1755_v42 }
 0x989   :  { %v1680_v7 = vmul.f32 %v1839_v21, %v1678_v49  ;;  %v1698_v50 = vmul.f32 %v1840_v29, %v1678_v49  ;;  %v1714_v44 = vmul.f32 -0.10054824, %v1713_v0  ;;  %v1741_v57 = vmul.f32 -0.06099666, %v1740_v53 }
 0x98a   :  { %v1735_v18 = vmul.f32 0.43304965, %v1734_v46  ;;  %v1747_v36 = vmul.f32 0.14122325, %v1746_v11 }
 0x98b   :  { %v1681_v14 = vmul.f32 -0.39626524, %v1680_v7  ;;  %v1699_v22 = vmul.f32 -0.29442644, %v1698_v50  ;;  %v1716_v26 = vrot.slane %v1714_v44, 4  ;;  %v1743_v28 = vrot.slane %v1741_v57, 4 }
 0x98c   :  { %v1737_v8 = vrot.slane %v1735_v18, 4  ;;  %v1749_v48 = vrot.slane %v1747_v36, 4 }
 0x98d   :  { %v1682_v3 = vadd.f32 %v1681_v14, %v1676_v59 }
 0x98f   :  { %v1685_v15 = vadd.f32 %v1684_v19, %v1682_v3 }
 0x991   :  { %v1691_v16 = vadd.f32 %v1690_v5, %v1685_v15 }
 0x993   :  { %v1694_v62 = vadd.f32 %v1693_v24, %v1691_v16 }
 0x995   :  { %v1697_v45 = vadd.f32 %v1696_v47, %v1694_v62 }
 0x997   :  { %v1700_v4 = vadd.f32 %v1699_v22, %v1697_v45 }
 0x999   :  { %v1703_v21 = vadd.f32 %v1702_v63, %v1700_v4 }
 0x99b   :  { %v1706_v2 = vadd.f32 %v1705_v52, %v1703_v21 }
 0x99d   :  { %v1712_v56 = vadd.f32 %v1710_v55, %v1706_v2 }
 0x99f   :  { %v1718_v29 = vadd.f32 %v1716_v26, %v1712_v56 }
 0x9a1   :  { %v1727_v34 = vadd.f32 %v1725_v31, %v1718_v29 }
 0x9a3   :  { %v1733_v35 = vadd.f32 %v1731_v33, %v1727_v34 }
 0x9a5   :  { %v1739_v38 = vadd.f32 %v1737_v8, %v1733_v35 }
 0x9a7   :  { %v1745_v60 = vadd.f32 %v1743_v28, %v1739_v38 }
 0x9a9   :  { %v1751_v61 = vadd.f32 %v1749_v48, %v1745_v60 }
 0x9ab   :  { %v1754_v1 = vadd.f32 %v1753_v20, %v1751_v61 }
 0x9ad   :  { %v1757_v27 = vadd.f32 %v1756_v23, %v1754_v1 }
 0x9af   :  { %v1763_v59 = vadd.f32 %v1761_v41, %v1757_v27 }
 0x9b1   :  { %v1764_v10 = vmax.f32 %v1763_v59, 0.0 }
 0x9b3   :  { %2301 = vrsqrt.f32 %v1764_v10  ;;  %vm1767_vm2 = vcmp.eq.f32.partialorder %v1764_v10, inf  ;;  %v1770_v43 = vand.u32 2147483648, %v1764_v10  ;;  %vm1769_vm4 = vcmp.eq.f32.partialorder %v1764_v10, 0.0 }
 0x9bd   :  { %v2302_v6 = vpop.eup %2301 }
 0x9be   :  { %v1766_v40 = vmul.f32 %v2302_v6, %v1764_v10 }
 0x9c0   :  { %v1768_v32 = vsel %vm1767_vm2, %v1764_v10, %v1766_v40 }
 0x9c1   :  { %v1771_v39 = vsel %vm1769_vm4, %v1770_v43, %v1768_v32 }
 0x9c2   :  { %1788 = vrot.lane.b32.xlu0 %v1771_v39, %s2435_s6  ;;  %v1773_v9 = vsel %vm1772_vm3, %v1771_v39, 0.0 }
 0x9c3   :  { %1774 = vadd.xlane.f32.xlu1 %v1773_v9 }
 0xa34   :  { %v1789_v58 = vpop.permute.xlu0 %1788 }
 0xa35   :  { %v1791_v49 = vsel %vm1772_vm3, %v1789_v58, 0.0 }
 0xa36   :  { %1792 = vadd.xlane.f32.xlu0 %v1791_v49 }
 0xa50   :  { %v1775_v42 = vpop.xlane.xlu1 %1774 }
 0xa51   :  { %v1776_v0 = vrot.slane %v1775_v42, 4 }
 0xa53   :  { %v1777_v53 = vadd.f32 %v1776_v0, %v1775_v42 }
 0xa55   :  { %v1778_v11 = vrot.slane %v1777_v53, 2 }
 0xa57   :  { %v1779_v7 = vadd.f32 %v1778_v11, %v1777_v53 }
 0xa59   :  { %v1780_v14 = vrot.slane %v1779_v7, 1 }
 0xa5b   :  { %v1781_v3 = vadd.f32 %v1780_v14, %v1779_v7 }
 0xa5d   :  { %2194 = vpush %v1781_v3 }
 0xa8e   :  { %s2195_s20 = spop %2194 }
 0xa8f   :  { %v1783_v19 = vstv %s2195_s20 }
 0xa90   :  { %v1784_v54 = vmul.f32 0.0625, %v1783_v19 }
 0xa92   :  { %1786 = vst.msk [vmem:[%s2955_s7] sm:$0x1] %vm1785_vm5, %v1784_v54 }
 0xac3   :  { %v1793_v15 = vpop.xlane.xlu0 %1792 }
 0xac4   :  { %v1794_v5 = vrot.slane %v1793_v15, 4 }
 0xac6   :  { %v1795_v16 = vadd.f32 %v1794_v5, %v1793_v15 }
 0xac8   :  { %v1796_v24 = vrot.slane %v1795_v16, 2 }
 0xaca   :  { %v1797_v50 = vadd.f32 %v1796_v24, %v1795_v16 }
 0xacc   :  { %v1798_v17 = vrot.slane %v1797_v50, 1 }
 0xace   :  { %v1799_v62 = vadd.f32 %v1798_v17, %v1797_v50 }
 0xad0   :  { %2196 = vpush %v1799_v62 }
 0xb01   :  { %s2197_s23 = spop %2196 }
 0xb02   :  { %v1801_v47 = vstv %s2197_s23 }
 0xb03   :  { %v1802_v45 = vmul.f32 0.0625, %v1801_v47 }
 0xb05   :  { %1845 = vst.msk [vmem:[%s2955_s7 + $0x1] sm:$0x1] %vm1785_vm5, %v1802_v45 }
 0xb06   :  { %1809 = vsyncpa [#allocation4], 1 }
 0xb07   :  { %1810 = vsyncpa [#allocation6], 1 }
 0xb08   :  { %1811 = vsyncpa [#allocation9], 1 }

</bundles_post_ra>
